<compile_context>
chip_gen: v5e
topology: v5e:2x2
jax: 0.10.0
libtpu: 0.0.40
codegen_flags: <defaults>
</compile_context>

<pallas_src>
import functools

import jax
import jax.numpy as jnp
from jax.experimental import pallas as pl
from jax.experimental.pallas import tpu as pltpu


_LANE = 128
_VMEM_LIMIT = 48 * 1024 * 1024          # safe on v5e/v6e (128 MiB) and v7x (64 MiB)
_FUSED_BYTES_BUDGET = 12 * 1024 * 1024  # conservative "whole layer fits" threshold


# --------------------------------------------------------------------------- #
# small helpers
# --------------------------------------------------------------------------- #
def _round_up(x, m=_LANE):
    return ((x + m - 1) // m) * m


def _pad2d(x, rows, cols):
    r, c = x.shape
    if r == rows and c == cols:
        return x
    return jnp.pad(x, ((0, rows - r), (0, cols - c)))


def _choose_row_tile(dim):
    # dim is already a multiple of 128.  Prefer 256 (MXU-friendly on v6e/v7x)
    # but keep at least 2 row tiles so both v7x TensorCores get work.
    if dim >= 512 and dim % 256 == 0:
        return 256
    return min(dim, 128)


def _choose_k_tile(dim):
    if dim % 256 == 0:
        return 256
    return min(dim, 128)


def _mish(y):
    # Mish(y) = y * tanh(softplus(y)), overflow-safe softplus.
    sp = jnp.maximum(y, 0.0) + jnp.log1p(jnp.exp(-jnp.abs(y)))
    return y * jnp.tanh(sp)


# --------------------------------------------------------------------------- #
# Kernel 1: tiled matmul  H = X @ W   (W resident in VMEM)
# --------------------------------------------------------------------------- #
def _matmul_kernel(x_ref, w_ref, o_ref, acc_ref, *, tk):
    kk = pl.program_id(1)

    @pl.when(kk == 0)
    def _():
        acc_ref[...] = jnp.zeros_like(acc_ref)

    off = pl.multiple_of(kk * tk, tk)
    w_chunk = w_ref[pl.ds(off, tk), :]
    acc_ref[...] += jnp.dot(x_ref[...], w_chunk,
                            preferred_element_type=jnp.float32)

    @pl.when(kk == pl.num_programs(1) - 1)
    def _():
        o_ref[...] = acc_ref[...].astype(o_ref.dtype)


def _matmul(x, w, *, out_dtype=jnp.bfloat16):
    m, k = x.shape
    _, n = w.shape
    tm = _choose_row_tile(m)
    tk = _choose_k_tile(k)
    cost = pl.CostEstimate(flops=2 * m * k * n, transcendentals=0,
                           bytes_accessed=2 * (m * k + k * n) + 2 * m * n)
    return pl.pallas_call(
        functools.partial(_matmul_kernel, tk=tk),
        out_shape=jax.ShapeDtypeStruct((m, n), out_dtype),
        grid=(m // tm, k // tk),
        in_specs=[
            pl.BlockSpec((tm, tk), lambda i, kk: (i, kk)),
            # W stays resident (constant block index => no re-DMA per row tile)
            pl.BlockSpec((k, n), lambda i, kk: (0, 0)),
        ],
        out_specs=pl.BlockSpec((tm, n), lambda i, kk: (i, 0)),
        scratch_shapes=[pltpu.VMEM((tm, n), jnp.float32)],
        compiler_params=pltpu.CompilerParams(
            dimension_semantics=("parallel", "arbitrary"),
            vmem_limit_bytes=_VMEM_LIMIT),
        cost_estimate=cost,
    )(x, w)


# --------------------------------------------------------------------------- #
# Kernel 2: fused aggregate  Y = Mish((A_hat @ H) * scale + shift)
#           (H resident in VMEM, bias already folded into shift)
# --------------------------------------------------------------------------- #
def _aggregate_kernel(a_ref, h_ref, scale_ref, shift_ref, o_ref, acc_ref, *, tk):
    kk = pl.program_id(1)

    @pl.when(kk == 0)
    def _():
        acc_ref[...] = jnp.zeros_like(acc_ref)

    off = pl.multiple_of(kk * tk, tk)
    h_chunk = h_ref[pl.ds(off, tk), :]
    acc_ref[...] += jnp.dot(a_ref[...], h_chunk,
                            preferred_element_type=jnp.float32)

    @pl.when(kk == pl.num_programs(1) - 1)
    def _():
        y = acc_ref[...] * scale_ref[...] + shift_ref[...]
        o_ref[...] = _mish(y).astype(o_ref.dtype)


def _aggregate(a, h, scale, shift, *, out_dtype):
    m, n_src = a.shape
    f = h.shape[1]
    tm = _choose_row_tile(m)
    tk = _choose_k_tile(n_src)
    cost = pl.CostEstimate(
        flops=2 * m * n_src * f + 2 * m * f,
        transcendentals=3 * m * f,
        bytes_accessed=2 * (m * n_src + n_src * f) + 4 * m * f + 8 * f)
    return pl.pallas_call(
        functools.partial(_aggregate_kernel, tk=tk),
        out_shape=jax.ShapeDtypeStruct((m, f), out_dtype),
        grid=(m // tm, n_src // tk),
        in_specs=[
            pl.BlockSpec((tm, tk), lambda i, kk: (i, kk)),
            # H stays resident in VMEM across the whole grid
            pl.BlockSpec((n_src, f), lambda i, kk: (0, 0)),
            pl.BlockSpec((1, f), lambda i, kk: (0, 0)),
            pl.BlockSpec((1, f), lambda i, kk: (0, 0)),
        ],
        out_specs=pl.BlockSpec((tm, f), lambda i, kk: (i, 0)),
        scratch_shapes=[pltpu.VMEM((tm, f), jnp.float32)],
        compiler_params=pltpu.CompilerParams(
            dimension_semantics=("parallel", "arbitrary"),
            vmem_limit_bytes=_VMEM_LIMIT),
        cost_estimate=cost,
    )(a, h, scale, shift)


# --------------------------------------------------------------------------- #
# Kernel 3: fully-fused single-call layer (small graphs: everything in VMEM)
#           Y = Mish((A_hat @ (X @ W)) * scale + shift)
# --------------------------------------------------------------------------- #
def _fused_layer_kernel(a_ref, x_ref, w_ref, scale_ref, shift_ref, o_ref):
    h = jnp.dot(x_ref[...], w_ref[...], preferred_element_type=jnp.float32)
    y = jnp.dot(a_ref[...], h.astype(jnp.bfloat16),
                preferred_element_type=jnp.float32)
    y = y * scale_ref[...] + shift_ref[...]
    o_ref[...] = _mish(y).astype(o_ref.dtype)


def _fused_layer(a, x, w, scale, shift, *, out_dtype):
    m, k = x.shape
    f = w.shape[1]
    cost = pl.CostEstimate(
        flops=2 * m * k * f + 2 * m * m * f + 2 * m * f,
        transcendentals=3 * m * f,
        bytes_accessed=2 * (m * m + m * k + k * f) + 4 * m * f + 8 * f)
    return pl.pallas_call(
        _fused_layer_kernel,
        out_shape=jax.ShapeDtypeStruct((m, f), out_dtype),
        grid=(1,),
        in_specs=[
            pl.BlockSpec((m, m), lambda i: (0, 0)),
            pl.BlockSpec((m, k), lambda i: (0, 0)),
            pl.BlockSpec((k, f), lambda i: (0, 0)),
            pl.BlockSpec((1, f), lambda i: (0, 0)),
            pl.BlockSpec((1, f), lambda i: (0, 0)),
        ],
        out_specs=pl.BlockSpec((m, f), lambda i: (0, 0)),
        compiler_params=pltpu.CompilerParams(
            dimension_semantics=("arbitrary",),
            vmem_limit_bytes=_VMEM_LIMIT),
        cost_estimate=cost,
    )(a, x, w, scale, shift)


def _fused_fits(n_pad, fin_pad, fout_pad):
    needed = (2 * (n_pad * n_pad + n_pad * fin_pad + fin_pad * fout_pad)
              + 4 * n_pad * fout_pad + 8 * fout_pad)
    return 3 * needed < _FUSED_BYTES_BUDGET   # 3x headroom for buffering/temps


# --------------------------------------------------------------------------- #
# Wrapper: GCNConv normalization (dense A_hat) + layer loop
# --------------------------------------------------------------------------- #
def _gcn_normalized_adjacency(edge_index, num_nodes):
    """A_hat[t, s] = deg^-1/2[s] * deg^-1/2[t] for each edge s->t (no self loops)."""
    src = edge_index[0]
    dst = edge_index[1]
    ones = jnp.ones(src.shape[0], jnp.float32)
    deg = jnp.zeros((num_nodes,), jnp.float32).at[dst].add(ones)
    dinv = jnp.where(deg > 0, jax.lax.rsqrt(jnp.maximum(deg, 1.0)), 0.0)
    norm = dinv[src] * dinv[dst]
    return jnp.zeros((num_nodes, num_nodes), jnp.float32).at[dst, src].add(norm)


def encoder_forward(protein_feat, protein_edge_index, protein_nodes_batch,
                    layer_params, *, force_tiled=False):
    """Matches Encoder.forward (GCNConv + BatchNorm(eval) + Mish per layer)."""
    del protein_nodes_batch  # accepted (as in the PyTorch forward) but unused there
    n, f_in = protein_feat.shape
    n_pad = _round_up(max(n, _LANE))
    f_in_pad = _round_up(max(f_in, _LANE))

    a_hat = _gcn_normalized_adjacency(protein_edge_index, n)
    a_hat = _pad2d(a_hat, n_pad, n_pad).astype(jnp.bfloat16)
    h = _pad2d(protein_feat.astype(jnp.float32), n_pad, f_in_pad).astype(jnp.bfloat16)

    num_layers = len(layer_params)
    f_out = f_in
    for li, (w, b, bn_scale, bn_shift) in enumerate(layer_params):
        fin, fout = w.shape
        fin_pad = _round_up(max(fin, _LANE))
        fout_pad = _round_up(max(fout, _LANE))
        w_p = _pad2d(w.astype(jnp.float32), fin_pad, fout_pad).astype(jnp.bfloat16)

        # Fold the GCN bias into the eval-mode BatchNorm shift:
        #   (AxW + b) * s + t  ==  (AxW) * s + (b*s + t)
        scale = bn_scale.astype(jnp.float32)
        shift = b.astype(jnp.float32) * scale + bn_shift.astype(jnp.float32)
        scale_p = _pad2d(scale.reshape(1, -1), 1, fout_pad)
        shift_p = _pad2d(shift.reshape(1, -1), 1, fout_pad)

        last = li == num_layers - 1
        out_dtype = jnp.float32 if last else jnp.bfloat16

        if (not force_tiled) and _fused_fits(n_pad, fin_pad, fout_pad):
            h = _fused_layer(a_hat, h, w_p, scale_p, shift_p, out_dtype=out_dtype)
        else:
            hw = _matmul(h, w_p, out_dtype=jnp.bfloat16)
            h = _aggregate(a_hat, hw, scale_p, shift_p, out_dtype=out_dtype)
        f_out = fout

    return h[:n, :f_out].astype(jnp.float32), None  # (protein_feat, protein_attention_list)


# --------------------------------------------------------------------------- #
# Pure-JAX reference (f32, HIGHEST precision, unpadded)
# --------------------------------------------------------------------------- #
def _reference_forward(x, a_hat, layer_params):
    h = x
    hi = jax.lax.Precision.HIGHEST
    for (w, b, scale, shift) in layer_params:
        y = jnp.dot(a_hat, jnp.dot(h, w, precision=hi), precision=hi)
        y = (y + b[None, :]) * scale[None, :] + shift[None, :]
        h = _mish(y)
    return h


def _make_problem(key, n, dims, n_edges):
    k_feat, k_edge, *k_params = jax.random.split(key, 2 + 4 * (len(dims) - 1))
    protein_feat = jax.random.normal(k_feat, (n, dims[0]), jnp.float32)

    # Undirected edge_index in PyG layout [2, num_edges] (both directions).
    src = jax.random.randint(k_edge, (n_edges,), 0, n, jnp.int32)
    dst = jax.random.randint(jax.random.fold_in(k_edge, 1), (n_edges,), 0, n, jnp.int32)
    edge_index = jnp.stack([jnp.concatenate([src, dst]),
                            jnp.concatenate([dst, src])], axis=0)
    nodes_batch = jnp.zeros((n,), jnp.int32)

    layer_params = []
    for l in range(len(dims) - 1):
        fin, fout = dims[l], dims[l + 1]
        kw, kb, km, kv = k_params[4 * l: 4 * l + 4]
        bound = (6.0 / (fin + fout)) ** 0.5
        w = jax.random.uniform(kw, (fin, fout), jnp.float32, -bound, bound)
        b = jax.random.uniform(kb, (fout,), jnp.float32, -0.1, 0.1)
        gamma = jnp.ones((fout,), jnp.float32)
        beta = jnp.zeros((fout,), jnp.float32)
        running_mean = jax.random.normal(km, (fout,), jnp.float32) * 0.1
        running_var = jax.random.uniform(kv, (fout,), jnp.float32, 0.5, 1.5)
        eps = 1e-5
        bn_scale = gamma / jnp.sqrt(running_var + eps)
        bn_shift = beta - running_mean * bn_scale
        layer_params.append((w, b, bn_scale, bn_shift))
    return protein_feat, edge_index, nodes_batch, layer_params


if __name__ == "__main__":
    key = jax.random.PRNGKey(0)
    cases = [
        # (N, GNNDimensions, E) — scaled-down versions of [1024, 720, 360]
        (256, [256, 128, 128], 512),   # lane-dense shapes
        (250, [200, 144, 96], 480),    # exercises wrapper-side padding
    ]

    for ci, (N, dims, E) in enumerate(cases):
        feat, edge_index, nodes_batch, layer_params = _make_problem(
            jax.random.fold_in(key, ci), N, dims, E)

        a_hat_ref = _gcn_normalized_adjacency(edge_index, N)
        ref = _reference_forward(feat, a_hat_ref, layer_params)

        for force_tiled in (False, True):
            out, attn = encoder_forward(feat, edge_index, nodes_batch,
                                        layer_params, force_tiled=force_tiled)
            out = jax.block_until_ready(out)
            assert out.shape == (N, dims[-1])
            assert attn is None
            err = float(jnp.max(jnp.abs(out - ref)))
            assert jnp.allclose(out, ref, atol=3e-2, rtol=3e-2), \
                (ci, force_tiled, err)

    print("KERNEL_OK")
</pallas_src>

<mosaic_0001>
module attributes {stable_mosaic.version = 11 : i64} {
  func.func @_fused_layer_kernel(%arg0: i32, %arg1: memref<256x256xbf16, #tpu.memory_space<vmem>>, %arg2: memref<256x256xbf16, #tpu.memory_space<vmem>>, %arg3: memref<256x128xbf16, #tpu.memory_space<vmem>>, %arg4: memref<1x128xf32, #tpu.memory_space<vmem>>, %arg5: memref<1x128xf32, #tpu.memory_space<vmem>>, %arg6: memref<256x128xbf16, #tpu.memory_space<vmem>>) attributes {dimension_semantics = [#tpu.dimension_semantics<arbitrary>], iteration_bounds = array<i64: 1>, scalar_prefetch = 0 : i64, scratch_operands = 0 : i64, tpu.core_type = #tpu.core_type<tc>, window_params = [{pipeline_mode = #tpu.pipeline_mode<synchronous>, transform_indices = @transform_0, window_bounds = array<i64: 256, 256>}, {pipeline_mode = #tpu.pipeline_mode<synchronous>, transform_indices = @transform_1, window_bounds = array<i64: 256, 256>}, {pipeline_mode = #tpu.pipeline_mode<synchronous>, transform_indices = @transform_2, window_bounds = array<i64: 256, 128>}, {pipeline_mode = #tpu.pipeline_mode<synchronous>, transform_indices = @transform_3, window_bounds = array<i64: 1, 128>}, {pipeline_mode = #tpu.pipeline_mode<synchronous>, transform_indices = @transform_4, window_bounds = array<i64: 1, 128>}, {pipeline_mode = #tpu.pipeline_mode<synchronous>, transform_indices = @transform_5, window_bounds = array<i64: 256, 128>}]} {
    %c0 = arith.constant 0 : index
    %c0_0 = arith.constant 0 : index
    %0 = vector.load %arg2[%c0, %c0_0] : memref<256x256xbf16, #tpu.memory_space<vmem>>, vector<256x256xbf16>
    %c0_1 = arith.constant 0 : index
    %c0_2 = arith.constant 0 : index
    %1 = vector.load %arg3[%c0_1, %c0_2] : memref<256x128xbf16, #tpu.memory_space<vmem>>, vector<256x128xbf16>
    %cst = arith.constant dense<0.000000e+00> : vector<256x128xf32>
    %2 = tpu.matmul %0, %1, %cst {dimension_numbers = #tpu.dot_dimension_numbers<[1], [0], [0], [1], [0, 0, 1, 1], [], []>} : vector<256x256xbf16>, vector<256x128xbf16>, vector<256x128xf32> -> vector<256x128xf32>
    %c0_3 = arith.constant 0 : index
    %c0_4 = arith.constant 0 : index
    %3 = vector.load %arg1[%c0_3, %c0_4] : memref<256x256xbf16, #tpu.memory_space<vmem>>, vector<256x256xbf16>
    %4 = arith.truncf %2 : vector<256x128xf32> to vector<256x128xbf16>
    %cst_5 = arith.constant dense<0.000000e+00> : vector<256x128xf32>
    %5 = tpu.matmul %3, %4, %cst_5 {dimension_numbers = #tpu.dot_dimension_numbers<[1], [0], [0], [1], [0, 0, 1, 1], [], []>} : vector<256x256xbf16>, vector<256x128xbf16>, vector<256x128xf32> -> vector<256x128xf32>
    %c0_6 = arith.constant 0 : index
    %c0_7 = arith.constant 0 : index
    %6 = vector.load %arg4[%c0_6, %c0_7] : memref<1x128xf32, #tpu.memory_space<vmem>>, vector<1x128xf32>
    %7 = vector.broadcast %6 : vector<1x128xf32> to vector<256x128xf32>
    %8 = arith.mulf %5, %7 : vector<256x128xf32>
    %c0_8 = arith.constant 0 : index
    %c0_9 = arith.constant 0 : index
    %9 = vector.load %arg5[%c0_8, %c0_9] : memref<1x128xf32, #tpu.memory_space<vmem>>, vector<1x128xf32>
    %10 = vector.broadcast %9 : vector<1x128xf32> to vector<256x128xf32>
    %11 = arith.addf %8, %10 : vector<256x128xf32>
    %cst_10 = arith.constant 0.000000e+00 : f32
    %12 = vector.broadcast %cst_10 : f32 to vector<256x128xf32>
    %13 = arith.maximumf %11, %12 : vector<256x128xf32>
    %14 = math.absf %11 : vector<256x128xf32>
    %cst_11 = arith.constant 0.000000e+00 : f32
    %15 = vector.broadcast %cst_11 : f32 to vector<256x128xf32>
    %16 = arith.subf %15, %14 : vector<256x128xf32>
    %17 = math.exp %16 : vector<256x128xf32>
    %18 = math.log1p %17 : vector<256x128xf32>
    %19 = arith.addf %13, %18 : vector<256x128xf32>
    %20 = math.tanh %19 : vector<256x128xf32>
    %21 = arith.mulf %11, %20 : vector<256x128xf32>
    %22 = arith.truncf %21 : vector<256x128xf32> to vector<256x128xbf16>
    %c0_12 = arith.constant 0 : index
    %c0_13 = arith.constant 0 : index
    %23 = vector.load %arg6[%c0_12, %c0_13] : memref<256x128xbf16, #tpu.memory_space<vmem>>, vector<256x128xbf16>
    tpu.vector_store %arg6[%c0_12, %c0_13], %22 {strides = array<i32>} : memref<256x128xbf16, #tpu.memory_space<vmem>>, vector<256x128xbf16>,
    return
  }
  func.func @transform_0(%arg0: i32) -> (i32, i32) {
    %c0_i32 = arith.constant 0 : i32
    %c0_i32_0 = arith.constant 0 : i32
    %c0_i32_1 = arith.constant 0 : i32
    return %c0_i32, %c0_i32_0 : i32, i32
  }
  func.func @transform_1(%arg0: i32) -> (i32, i32) {
    %c0_i32 = arith.constant 0 : i32
    %c0_i32_0 = arith.constant 0 : i32
    %c0_i32_1 = arith.constant 0 : i32
    return %c0_i32, %c0_i32_0 : i32, i32
  }
  func.func @transform_2(%arg0: i32) -> (i32, i32) {
    %c0_i32 = arith.constant 0 : i32
    %c0_i32_0 = arith.constant 0 : i32
    %c0_i32_1 = arith.constant 0 : i32
    return %c0_i32, %c0_i32_0 : i32, i32
  }
  func.func @transform_3(%arg0: i32) -> (i32, i32) {
    %c0_i32 = arith.constant 0 : i32
    %c0_i32_0 = arith.constant 0 : i32
    %c0_i32_1 = arith.constant 0 : i32
    return %c0_i32, %c0_i32_0 : i32, i32
  }
  func.func @transform_4(%arg0: i32) -> (i32, i32) {
    %c0_i32 = arith.constant 0 : i32
    %c0_i32_0 = arith.constant 0 : i32
    %c0_i32_1 = arith.constant 0 : i32
    return %c0_i32, %c0_i32_0 : i32, i32
  }
  func.func @transform_5(%arg0: i32) -> (i32, i32) {
    %c0_i32 = arith.constant 0 : i32
    %c0_i32_0 = arith.constant 0 : i32
    %c0_i32_1 = arith.constant 0 : i32
    return %c0_i32, %c0_i32_0 : i32, i32
  }
}

</mosaic_0001>

<bundles_post_ra>
// kernel: tpu_custom_call.1
= control target key start
LH: loop header
LB: loop body
LE: loop exit
PB: predicated region body
PF: predicated region fallthrough
CT: control target
= control target key end

     0   :  { %10 = vsyncpa [#allocation3], 0  ;;  %s2861_s0 = inlined_call_operand.hbm [shape: bf16[256,256], index: 0, kind: input, shape index: {}]   ;;  %s2862_s1 = inlined_call_operand.hbm [shape: bf16[256,256], index: 1, kind: input, shape index: {}]   ;;  %s2863_s2 = inlined_call_operand.hbm [shape: bf16[256,128], index: 2, kind: input, shape index: {}]   ;;  %s2864_s3 = inlined_call_operand.vmem [shape: f32[1,128], index: 3, kind: input, shape index: {}]   ;;  %s2865_s4 = inlined_call_operand.vmem [shape: f32[1,128], index: 4, kind: input, shape index: {}]   ;;  %s2866_s5 = inlined_call_operand.hbm [shape: bf16[256,128], index: 5, kind: output, shape index: {}]  }
   0x1   :  { %11 = vsyncpa [#allocation6], 0 }
   0x2   :  { %12 = vsyncpa [#allocation4], 0  ;;  %s30_s20 = sshll.u32 %s2862_s1, 4  ;;  %s2453_s21 = smov [#allocation5]   ;;  %s31_s20 = int_to_ptr.hbm [resolvable:$true] %s30_s20 }
   0x3   :  { %s32_s22 = sshll.u32 %s2453_s21, 4  ;;  %s17_s25 = sshll.u32 %s2861_s0, 4  ;;  %s33_s22 = int_to_ptr.vmem [resolvable:$true] %s32_s22  ;;  %s18_s25 = int_to_ptr.hbm [resolvable:$true] %s17_s25 }
   0x4   :  { %s2454_s26 = smov 128   ;;  %s2455_s27 = smov 8  }
   0x5   :  { %38 = dma.hbm_to_vmem [thread:$0]  %s31_s20, 4096, %s33_s22, [#allocation6], %s2454_s26, %s2454_s26, %s2455_s27  }
   0x6   :  { %s2456_s28 = smov [#allocation2]   ;;  %s43_s7 = sshll.u32 %s2863_s2, 4  ;;  %s44_s7 = int_to_ptr.hbm [resolvable:$true] %s43_s7 }
   0x7   :  { %s19_s29 = sshll.u32 %s2456_s28, 4  ;;  %s2457_s1 = smov [#allocation7]   ;;  %s20_s29 = int_to_ptr.vmem [resolvable:$true] %s19_s29 }
   0x8   :  { %25 = dma.hbm_to_vmem [thread:$0]  %s18_s25, 4096, %s20_s29, [#allocation3], %s2454_s26, %s2454_s26, %s2455_s27  }
   0x9   :  { %s45_s8 = sshll.u32 %s2457_s1, 4  ;;  %s2458_s9 = smov 64   ;;  %s46_s8 = int_to_ptr.vmem [resolvable:$true] %s45_s8 }
   0xa   :  { %s2459_s10 = smov 4  }
   0xb   :  { %51 = dma.hbm_to_vmem [thread:$0]  %s44_s7, 2048, %s46_s8, [#allocation6], %s2458_s9, %s2458_s9, %s2459_s10  }
   0xc   :  { %2447 = dma.done.wait [#allocation3], 4096  }
   0xd   :  { %2448 = vsyncadd [#allocation3], 4294963200 }
   0xe   :  { %2449 = dma.done.wait [#allocation6], 6144  }
   0xf   :  { %2450 = vsyncadd [#allocation6], 4294961152  ;;  %v2011_v0 = vld [vmem:[#allocation7 + $0x38] sm:$0xff]  ;;  %v2010_v2 = vld [vmem:[#allocation7 + $0x30] sm:$0xff]  ;;  %s1638_s19 = sshll.u32 %s2866_s5, 4  ;;  %s1639_s19 = int_to_ptr.hbm [resolvable:$true] %s1638_s19 }
  0x10   :  { %v2019_v1 = vld [vmem:[#allocation7 + $0x78] sm:$0xff]  ;;  %388 = vmatpush.bf16.msra.mxu0 %v2011_v0  ;;  %v2018_v3 = vld [vmem:[#allocation7 + $0x70] sm:$0xff]  ;;  %v2009_v4 = vld [vmem:[#allocation7 + $0x28] sm:$0xff] }
  0x11   :  { %477 = vmatpush.bf16.msra.mxu1 %v2019_v1  ;;  %v2017_v5 = vld [vmem:[#allocation7 + $0x68] sm:$0xff]  ;;  %v2008_v6 = vld [vmem:[#allocation7 + $0x20] sm:$0xff]  ;;  %v2007_v8 = vld [vmem:[#allocation7 + $0x18] sm:$0xff] }
  0x12   :  { %v2016_v7 = vld [vmem:[#allocation7 + $0x60] sm:$0xff]  ;;  %v2015_v9 = vld [vmem:[#allocation7 + $0x58] sm:$0xff]  ;;  %v2006_v10 = vld [vmem:[#allocation7 + $0x10] sm:$0xff] }
  0x13   :  { %v2014_v11 = vld [vmem:[#allocation7 + $0x50] sm:$0xff]  ;;  %v2005_v12 = vld [vmem:[#allocation7 + $0x8] sm:$0xff]  ;;  %v2004_v14 = vld [vmem:[#allocation7] sm:$0xff] }
  0x14   :  { %389 = vmatpush.bf16.msra.mxu0 %v2010_v2  ;;  %v2013_v13 = vld [vmem:[#allocation7 + $0x48] sm:$0xff]  ;;  %v2012_v15 = vld [vmem:[#allocation7 + $0x40] sm:$0xff]  ;;  %v1662_v22 = vld [vmem:[#allocation5 + $0x10] sm:$0xf] }
  0x15   :  { %478 = vmatpush.bf16.msra.mxu1 %v2018_v3  ;;  %v1654_v16 = vld [vmem:[#allocation5] sm:$0xf]  ;;  %v1973_v17 = vld [vmem:[#allocation5 + $0x4] sm:$0xf0]  ;;  %v1972_v18 = vld [vmem:[#allocation5 + $0x4] sm:$0xf] }
  0x16   :  { %v1656_v19 = vld [vmem:[#allocation5 + $0x8] sm:$0xf0]  ;;  %v1655_v20 = vor.u32 %v1973_v17, %v1654_v16  ;;  %v1975_v23 = vld [vmem:[#allocation5 + $0x14] sm:$0xf0]  ;;  %v1974_v24 = vld [vmem:[#allocation5 + $0x14] sm:$0xf] }
  0x17   :  { %v1659_v21 = vor.u32 %v1972_v18, %v1656_v19  ;;  %v1664_v25 = vld [vmem:[#allocation5 + $0x18] sm:$0xf0]  ;;  %v1663_v26 = vor.u32 %v1975_v23, %v1662_v22  ;;  %v1670_v28 = vld [vmem:[#allocation5 + $0x20] sm:$0xf]  ;;  %v1977_v29 = vld [vmem:[#allocation5 + $0x24] sm:$0xf0] }
  0x18   :  { %390 = vmatpush.bf16.msra.mxu0 %v2009_v4  ;;  %v1667_v27 = vor.u32 %v1974_v24, %v1664_v25  ;;  %v1976_v30 = vld [vmem:[#allocation5 + $0x24] sm:$0xf]  ;;  %v1672_v31 = vld [vmem:[#allocation5 + $0x28] sm:$0xf0]  ;;  %v1671_v32 = vor.u32 %v1977_v29, %v1670_v28  ;;  %v1678_v34 = vld [vmem:[#allocation5 + $0x30] sm:$0xf] }
  0x19   :  { %479 = vmatpush.bf16.msra.mxu1 %v2017_v5  ;;  %v1675_v33 = vor.u32 %v1976_v30, %v1672_v31  ;;  %v1979_v35 = vld [vmem:[#allocation5 + $0x34] sm:$0xf0]  ;;  %v1978_v36 = vld [vmem:[#allocation5 + $0x34] sm:$0xf]  ;;  %v1680_v37 = vld [vmem:[#allocation5 + $0x38] sm:$0xf0] }
  0x1a   :  { %v1679_v38 = vor.u32 %v1979_v35, %v1678_v34  ;;  %v1683_v39 = vor.u32 %v1978_v36, %v1680_v37  ;;  %v1686_v40 = vld [vmem:[#allocation5 + $0x40] sm:$0xf]  ;;  %v1981_v41 = vld [vmem:[#allocation5 + $0x44] sm:$0xf0]  ;;  %v1980_v42 = vld [vmem:[#allocation5 + $0x44] sm:$0xf] }
  0x1b   :  { %v1688_v43 = vld [vmem:[#allocation5 + $0x48] sm:$0xf0]  ;;  %v1687_v44 = vor.u32 %v1981_v41, %v1686_v40  ;;  %v1694_v46 = vld [vmem:[#allocation5 + $0x50] sm:$0xf]  ;;  %v1983_v47 = vld [vmem:[#allocation5 + $0x54] sm:$0xf0] }
  0x1c   :  { %391 = vmatpush.bf16.msra.mxu0 %v2008_v6  ;;  %v1691_v45 = vor.u32 %v1980_v42, %v1688_v43  ;;  %v1982_v48 = vld [vmem:[#allocation5 + $0x54] sm:$0xf]  ;;  %v1696_v49 = vld [vmem:[#allocation5 + $0x58] sm:$0xf0]  ;;  %v1695_v50 = vor.u32 %v1983_v47, %v1694_v46  ;;  %v1702_v52 = vld [vmem:[#allocation5 + $0x60] sm:$0xf] }
  0x1d   :  { %480 = vmatpush.bf16.msra.mxu1 %v2016_v7  ;;  %v1699_v51 = vor.u32 %v1982_v48, %v1696_v49  ;;  %v1985_v53 = vld [vmem:[#allocation5 + $0x64] sm:$0xf0]  ;;  %v1984_v54 = vld [vmem:[#allocation5 + $0x64] sm:$0xf]  ;;  %v1704_v55 = vld [vmem:[#allocation5 + $0x68] sm:$0xf0] }
  0x1e   :  { %v1703_v56 = vor.u32 %v1985_v53, %v1702_v52  ;;  %v1707_v57 = vor.u32 %v1984_v54, %v1704_v55  ;;  %v1710_v58 = vld [vmem:[#allocation5 + $0x70] sm:$0xf]  ;;  %v1987_v59 = vld [vmem:[#allocation5 + $0x74] sm:$0xf0]  ;;  %v1986_v60 = vld [vmem:[#allocation5 + $0x74] sm:$0xf] }
  0x1f   :  { %v1712_v61 = vld [vmem:[#allocation5 + $0x78] sm:$0xf0]  ;;  %v1711_v62 = vor.u32 %v1987_v59, %v1710_v58  ;;  %v1718_v0 = vld [vmem:[#allocation5 + $0x80] sm:$0xf]  ;;  %v1989_v1 = vld [vmem:[#allocation5 + $0x84] sm:$0xf0] }
  0x20   :  { %392 = vmatpush.bf16.msra.mxu0 %v2007_v8  ;;  %v1715_v63 = vor.u32 %v1986_v60, %v1712_v61  ;;  %v1988_v2 = vld [vmem:[#allocation5 + $0x84] sm:$0xf]  ;;  %v1720_v3 = vld [vmem:[#allocation5 + $0x88] sm:$0xf0]  ;;  %v1719_v4 = vor.u32 %v1989_v1, %v1718_v0  ;;  %v1728_v16 = vld [vmem:[#allocation5 + $0x98] sm:$0xf0] }
  0x21   :  { %481 = vmatpush.bf16.msra.mxu1 %v2015_v9  ;;  %v1723_v5 = vor.u32 %v1988_v2, %v1720_v3  ;;  %v1734_v25 = vld [vmem:[#allocation5 + $0xa0] sm:$0xf]  ;;  %v1992_v28 = vld [vmem:[#allocation5 + $0xa4] sm:$0xf]  ;;  %v1736_v29 = vld [vmem:[#allocation5 + $0xa8] sm:$0xf0] }
  0x22   :  { %v1739_v31 = vor.u32 %v1992_v28, %v1736_v29  ;;  %v1995_v40 = vld [vmem:[#allocation5 + $0xb4] sm:$0xf0]  ;;  %v1994_v41 = vld [vmem:[#allocation5 + $0xb4] sm:$0xf]  ;;  %v1744_v42 = vld [vmem:[#allocation5 + $0xb8] sm:$0xf0] }
  0x23   :  { %v1997_v53 = vld [vmem:[#allocation5 + $0xc4] sm:$0xf0]  ;;  %v1996_v54 = vld [vmem:[#allocation5 + $0xc4] sm:$0xf]  ;;  %v1752_v55 = vld [vmem:[#allocation5 + $0xc8] sm:$0xf0] }
  0x24   :  { %393 = vmatpush.bf16.msra.mxu0 %v2006_v10  ;;  %v1999_v0 = vld [vmem:[#allocation5 + $0xd4] sm:$0xf0]  ;;  %v1998_v1 = vld [vmem:[#allocation5 + $0xd4] sm:$0xf]  ;;  %v1760_v2 = vld [vmem:[#allocation5 + $0xd8] sm:$0xf0] }
  0x25   :  { %482 = vmatpush.bf16.msra.mxu1 %v2014_v11  ;;  %v1776_v28 = vld [vmem:[#allocation5 + $0xf8] sm:$0xf0] }
  0x28   :  { %394 = vmatpush.bf16.msra.mxu0 %v2005_v12  ;;  %v1726_v12 = vld [vmem:[#allocation5 + $0x90] sm:$0xf] }
  0x29   :  { %483 = vmatpush.bf16.msra.mxu1 %v2013_v13 }
  0x2c   :  { %395 = vmatpush.bf16.msra.mxu0 %v2004_v14  ;;  %v1991_v14 = vld [vmem:[#allocation5 + $0x94] sm:$0xf0] }
  0x2d   :  { %484 = vmatpush.bf16.msra.mxu1 %v2012_v15  ;;  %v1990_v15 = vld [vmem:[#allocation5 + $0x94] sm:$0xf]  ;;  %v1727_v17 = vor.u32 %v1991_v14, %v1726_v12  ;;  %v2001_v12 = vld [vmem:[#allocation5 + $0xe4] sm:$0xf0]  ;;  %v2000_v14 = vld [vmem:[#allocation5 + $0xe4] sm:$0xf] }
  0x2e   :  { %v1731_v18 = vor.u32 %v1990_v15, %v1728_v16  ;;  %v1768_v15 = vld [vmem:[#allocation5 + $0xe8] sm:$0xf0] }
  0x2f   :  { %396 = vmatmul.bf16.vlgmr.msra.gmra.mxu0 %v1655_v20 }
  0x30   :  { %485 = vmatmul.bf16.vlgmr.msra.gmra.mxu1 %v1659_v21 }
  0x3f   :  { %401 = vmatmul.bf16.gmra.mxu0 %v1663_v26 }
  0x40   :  { %490 = vmatmul.bf16.gmra.mxu1 %v1667_v27  ;;  %v1993_v27 = vld [vmem:[#allocation5 + $0xa4] sm:$0xf0] }
  0x41   :  { %v1735_v30 = vor.u32 %v1993_v27, %v1734_v25  ;;  %v2003_v25 = vld [vmem:[#allocation5 + $0xf4] sm:$0xf0]  ;;  %v2002_v27 = vld [vmem:[#allocation5 + $0xf4] sm:$0xf] }
  0x4f   :  { %406 = vmatmul.bf16.gmra.mxu0 %v1671_v32 }
  0x50   :  { %495 = vmatmul.bf16.gmra.mxu1 %v1675_v33 }
  0x5f   :  { %411 = vmatmul.bf16.gmra.mxu0 %v1679_v38  ;;  %v1742_v38 = vld [vmem:[#allocation5 + $0xb0] sm:$0xf] }
  0x60   :  { %500 = vmatmul.bf16.gmra.mxu1 %v1683_v39  ;;  %v1743_v43 = vor.u32 %v1995_v40, %v1742_v38 }
  0x6f   :  { %416 = vmatmul.bf16.gmra.mxu0 %v1687_v44  ;;  %v1747_v44 = vor.u32 %v1994_v41, %v1744_v42 }
  0x70   :  { %505 = vmatmul.bf16.gmra.mxu1 %v1691_v45 }
  0x7f   :  { %421 = vmatmul.bf16.gmra.mxu0 %v1695_v50 }
  0x80   :  { %510 = vmatmul.bf16.gmra.mxu1 %v1699_v51  ;;  %v1750_v51 = vld [vmem:[#allocation5 + $0xc0] sm:$0xf] }
  0x8f   :  { %426 = vmatmul.bf16.gmra.mxu0 %v1703_v56  ;;  %v1751_v56 = vor.u32 %v1997_v53, %v1750_v51 }
  0x90   :  { %515 = vmatmul.bf16.gmra.mxu1 %v1707_v57  ;;  %v1755_v57 = vor.u32 %v1996_v54, %v1752_v55 }
  0x9f   :  { %431 = vmatmul.bf16.gmra.mxu0 %v1711_v62 }
  0xa0   :  { %520 = vmatmul.bf16.gmra.mxu1 %v1715_v63  ;;  %v1758_v63 = vld [vmem:[#allocation5 + $0xd0] sm:$0xf] }
  0xa1   :  { %v1759_v3 = vor.u32 %v1999_v0, %v1758_v63 }
  0xac   :  { %v397_v6 = vpop.f32.mrf.mxu0 }
  0xad   :  { %v486_v7 = vpop.f32.mrf.mxu1 }
  0xae   :  { %v2503_v8 = vadd.f32 %v486_v7, %v397_v6 }
  0xaf   :  { %436 = vmatmul.bf16.gmra.mxu0 %v1719_v4  ;;  %v1763_v4 = vor.u32 %v1998_v1, %v1760_v2 }
  0xb0   :  { %525 = vmatmul.bf16.gmra.mxu1 %v1723_v5 }
  0xb4   :  { %v399_v9 = vpop.f32.mrf.mxu0 }
  0xb5   :  { %v488_v10 = vpop.f32.mrf.mxu1 }
  0xb6   :  { %v2505_v11 = vadd.f32 %v488_v10, %v399_v9  ;;  %v1766_v10 = vld [vmem:[#allocation5 + $0xe0] sm:$0xf] }
  0xb7   :  { %v1767_v16 = vor.u32 %v2001_v12, %v1766_v10 }
  0xb8   :  { %v598_v13 = vpack.c.bf16 %v2505_v11, %v2503_v8 }
  0xbc   :  { %v402_v19 = vpop.f32.mrf.mxu0 }
  0xbd   :  { %v491_v20 = vpop.f32.mrf.mxu1 }
  0xbe   :  { %v2509_v21 = vadd.f32 %v491_v20, %v402_v19 }
  0xbf   :  { %441 = vmatmul.bf16.gmra.mxu0 %v1727_v17  ;;  %v1771_v17 = vor.u32 %v2000_v14, %v1768_v15 }
  0xc0   :  { %530 = vmatmul.bf16.gmra.mxu1 %v1731_v18 }
  0xc4   :  { %v404_v22 = vpop.f32.mrf.mxu0 }
  0xc5   :  { %v493_v23 = vpop.f32.mrf.mxu1 }
  0xc6   :  { %v2511_v24 = vadd.f32 %v493_v23, %v404_v22  ;;  %v1774_v23 = vld [vmem:[#allocation5 + $0xf0] sm:$0xf] }
  0xc7   :  { %v1775_v29 = vor.u32 %v2003_v25, %v1774_v23  ;;  %v1846_v23 = vld [vmem:[#allocation2] sm:$0xf]  ;;  %v2021_v25 = vld [vmem:[#allocation2 + $0x4] sm:$0xf0] }
  0xc8   :  { %v599_v26 = vpack.c.bf16 %v2511_v24, %v2509_v21 }
  0xcc   :  { %v407_v32 = vpop.f32.mrf.mxu0 }
  0xcd   :  { %v496_v33 = vpop.f32.mrf.mxu1 }
  0xce   :  { %v2515_v34 = vadd.f32 %v496_v33, %v407_v32 }
  0xcf   :  { %446 = vmatmul.bf16.gmra.mxu0 %v1735_v30  ;;  %v1779_v30 = vor.u32 %v2002_v27, %v1776_v28  ;;  %v1847_v27 = vor.u32 %v2021_v25, %v1846_v23  ;;  %v2039_v23 = vld [vmem:[#allocation2 + $0x94] sm:$0xf0] }
  0xd0   :  { %535 = vmatmul.bf16.gmra.mxu1 %v1739_v31 }
  0xd4   :  { %v409_v35 = vpop.f32.mrf.mxu0 }
  0xd5   :  { %v498_v36 = vpop.f32.mrf.mxu1 }
  0xd6   :  { %v2517_v37 = vadd.f32 %v498_v36, %v409_v35 }
  0xd8   :  { %v600_v39 = vpack.c.bf16 %v2517_v37, %v2515_v34 }
  0xdc   :  { %v412_v45 = vpop.f32.mrf.mxu0 }
  0xdd   :  { %v501_v46 = vpop.f32.mrf.mxu1 }
  0xde   :  { %v2521_v47 = vadd.f32 %v501_v46, %v412_v45 }
  0xdf   :  { %451 = vmatmul.bf16.gmra.mxu0 %v1743_v43 }
  0xe0   :  { %540 = vmatmul.bf16.gmra.mxu1 %v1747_v44 }
  0xe4   :  { %v414_v48 = vpop.f32.mrf.mxu0 }
  0xe5   :  { %v503_v49 = vpop.f32.mrf.mxu1 }
  0xe6   :  { %v2523_v50 = vadd.f32 %v503_v49, %v414_v48 }
  0xe8   :  { %v601_v52 = vpack.c.bf16 %v2523_v50, %v2521_v47 }
  0xec   :  { %v417_v58 = vpop.f32.mrf.mxu0 }
  0xed   :  { %v506_v59 = vpop.f32.mrf.mxu1 }
  0xee   :  { %v507_v60 = vadd.f32 %v506_v59, %v417_v58 }
  0xef   :  { %456 = vmatmul.bf16.gmra.mxu0 %v1751_v56 }
  0xf0   :  { %545 = vmatmul.bf16.gmra.mxu1 %v1755_v57 }
  0xf4   :  { %v419_v61 = vpop.f32.mrf.mxu0 }
  0xf5   :  { %v508_v62 = vpop.f32.mrf.mxu1 }
  0xf6   :  { %v509_v51 = vadd.f32 %v508_v62, %v419_v61 }
  0xf8   :  { %v602_v54 = vpack.c.bf16 %v509_v51, %v507_v60  ;;  %v2025_v51 = vld [vmem:[#allocation2 + $0x24] sm:$0xf0] }
  0xfc   :  { %v422_v5 = vpop.f32.mrf.mxu0 }
  0xfd   :  { %v511_v6 = vpop.f32.mrf.mxu1 }
  0xfe   :  { %v512_v48 = vadd.f32 %v511_v6, %v422_v5 }
  0xff   :  { %461 = vmatmul.bf16.gmra.mxu0 %v1759_v3 }
 0x100   :  { %550 = vmatmul.bf16.gmra.mxu1 %v1763_v4 }
 0x104   :  { %v424_v7 = vpop.f32.mrf.mxu0 }
 0x105   :  { %v513_v9 = vpop.f32.mrf.mxu1 }
 0x106   :  { %v514_v43 = vadd.f32 %v513_v9, %v424_v7 }
 0x108   :  { %v603_v53 = vpack.c.bf16 %v514_v43, %v512_v48  ;;  %v1862_v48 = vld [vmem:[#allocation2 + $0x20] sm:$0xf] }
 0x10c   :  { %v427_v18 = vpop.f32.mrf.mxu0 }
 0x10d   :  { %v516_v19 = vpop.f32.mrf.mxu1 }
 0x10e   :  { %v517_v42 = vadd.f32 %v516_v19, %v427_v18 }
 0x10f   :  { %466 = vmatmul.bf16.gmra.mxu0 %v1767_v16 }
 0x110   :  { %555 = vmatmul.bf16.gmra.mxu1 %v1771_v17 }
 0x114   :  { %v429_v20 = vpop.f32.mrf.mxu0 }
 0x115   :  { %v518_v22 = vpop.f32.mrf.mxu1 }
 0x116   :  { %v519_v40 = vadd.f32 %v518_v22, %v429_v20 }
 0x118   :  { %v604_v44 = vpack.c.bf16 %v519_v40, %v517_v42 }
 0x11c   :  { %v432_v31 = vpop.f32.mrf.mxu0 }
 0x11d   :  { %v521_v32 = vpop.f32.mrf.mxu1 }
 0x11e   :  { %v522_v36 = vadd.f32 %v521_v32, %v432_v31 }
 0x11f   :  { %471 = vmatmul.bf16.gmra.mxu0 %v1775_v29 }
 0x120   :  { %560 = vmatmul.bf16.gmra.mxu1 %v1779_v30 }
 0x124   :  { %v434_v33 = vpop.f32.mrf.mxu0 }
 0x125   :  { %v523_v35 = vpop.f32.mrf.mxu1 }
 0x126   :  { %v524_v38 = vadd.f32 %v523_v35, %v434_v33 }
 0x128   :  { %v605_v41 = vpack.c.bf16 %v524_v38, %v522_v36  ;;  %v1854_v36 = vld [vmem:[#allocation2 + $0x10] sm:$0xf]  ;;  %v2023_v38 = vld [vmem:[#allocation2 + $0x14] sm:$0xf0] }
 0x129   :  { %v1855_v42 = vor.u32 %v2023_v38, %v1854_v36  ;;  %v2036_v36 = vld [vmem:[#allocation2 + $0x84] sm:$0xf]  ;;  %v1912_v38 = vld [vmem:[#allocation2 + $0x88] sm:$0xf0] }
 0x12a   :  { %774 = vmatpush.bf16.msra.mxu2 %v605_v41 }
 0x12c   :  { %v437_v45 = vpop.f32.mrf.mxu0 }
 0x12d   :  { %v526_v46 = vpop.f32.mrf.mxu1 }
 0x12e   :  { %v2527_v49 = vadd.f32 %v526_v46, %v437_v45  ;;  %775 = vmatpush.bf16.msra.mxu2 %v604_v44 }
 0x132   :  { %776 = vmatpush.bf16.msra.mxu2 %v603_v53  ;;  %v1863_v53 = vor.u32 %v2025_v51, %v1862_v48  ;;  %v1934_v48 = vld [vmem:[#allocation2 + $0xb0] sm:$0xf]  ;;  %v2043_v51 = vld [vmem:[#allocation2 + $0xb4] sm:$0xf0] }
 0x134   :  { %v439_v55 = vpop.f32.mrf.mxu0 }
 0x135   :  { %v528_v56 = vpop.f32.mrf.mxu1 }
 0x136   :  { %v2529_v57 = vadd.f32 %v528_v56, %v439_v55  ;;  %777 = vmatpush.bf16.msra.mxu2 %v602_v54  ;;  %v2020_v54 = vld [vmem:[#allocation2 + $0x4] sm:$0xf]  ;;  %v1848_v55 = vld [vmem:[#allocation2 + $0x8] sm:$0xf0] }
 0x137   :  { %v1851_v56 = vor.u32 %v2020_v54, %v1848_v55  ;;  %v1935_v54 = vor.u32 %v2043_v51, %v1934_v48 }
 0x138   :  { %v606_v58 = vpack.c.bf16 %v2529_v57, %v2527_v49  ;;  %v2031_v49 = vld [vmem:[#allocation2 + $0x54] sm:$0xf0] }
 0x13a   :  { %778 = vmatpush.bf16.msra.mxu2 %v601_v52 }
 0x13c   :  { %v442_v59 = vpop.f32.mrf.mxu0 }
 0x13d   :  { %v531_v63 = vpop.f32.mrf.mxu1 }
 0x13e   :  { %v2536_v0 = vadd.f32 %v531_v63, %v442_v59  ;;  %779 = vmatpush.bf16.msra.mxu2 %v600_v39  ;;  %v1870_v59 = vld [vmem:[#allocation2 + $0x30] sm:$0xf]  ;;  %v2027_v63 = vld [vmem:[#allocation2 + $0x34] sm:$0xf0] }
 0x142   :  { %780 = vmatpush.bf16.msra.mxu2 %v599_v26 }
 0x144   :  { %v444_v60 = vpop.f32.mrf.mxu0 }
 0x145   :  { %v533_v61 = vpop.f32.mrf.mxu1 }
 0x146   :  { %v2544_v62 = vadd.f32 %v533_v61, %v444_v60  ;;  %781 = vmatpush.bf16.msra.mxu2 %v598_v13  ;;  %v2022_v60 = vld [vmem:[#allocation2 + $0x14] sm:$0xf]  ;;  %v1856_v61 = vld [vmem:[#allocation2 + $0x18] sm:$0xf0] }
 0x148   :  { %v607_v47 = vpack.c.bf16 %v2544_v62, %v2536_v0  ;;  %v1871_v0 = vor.u32 %v2027_v63, %v1870_v59  ;;  %v1859_v62 = vor.u32 %v2022_v60, %v1856_v61  ;;  %v1920_v59 = vld [vmem:[#allocation2 + $0x98] sm:$0xf0] }
 0x149   :  { %782 = vmatmul.bf16.vlgmr.msra.gmra.mxu2 %v1847_v27  ;;  %v2034_v27 = vld [vmem:[#allocation2 + $0x74] sm:$0xf] }
 0x14c   :  { %v447_v50 = vpop.f32.mrf.mxu0 }
 0x14d   :  { %v536_v52 = vpop.f32.mrf.mxu1 }
 0x14e   :  { %v537_v1 = vadd.f32 %v536_v52, %v447_v50  ;;  %v1878_v50 = vld [vmem:[#allocation2 + $0x40] sm:$0xf]  ;;  %v2029_v52 = vld [vmem:[#allocation2 + $0x44] sm:$0xf0] }
 0x154   :  { %v449_v34 = vpop.f32.mrf.mxu0 }
 0x155   :  { %v538_v37 = vpop.f32.mrf.mxu1 }
 0x156   :  { %v539_v39 = vadd.f32 %v538_v37, %v449_v34  ;;  %v1864_v34 = vld [vmem:[#allocation2 + $0x28] sm:$0xf0] }
 0x158   :  { %v608_v2 = vpack.c.bf16 %v539_v39, %v537_v1  ;;  %v1879_v1 = vor.u32 %v2029_v52, %v1878_v50  ;;  %v1886_v39 = vld [vmem:[#allocation2 + $0x50] sm:$0xf] }
 0x159   :  { %787 = vmatmul.bf16.gmra.mxu2 %v1855_v42  ;;  %v1887_v57 = vor.u32 %v2031_v49, %v1886_v39  ;;  %v2559_v42 = vld [vmem:[%s2864_s3] ss:$0 sm:$0xff] }
 0x15c   :  { %v452_v21 = vpop.f32.mrf.mxu0 }
 0x15d   :  { %v541_v24 = vpop.f32.mrf.mxu1 }
 0x15e   :  { %v542_v26 = vadd.f32 %v541_v24, %v452_v21  ;;  %v1894_v24 = vld [vmem:[#allocation2 + $0x60] sm:$0xf] }
 0x164   :  { %v454_v3 = vpop.f32.mrf.mxu0 }
 0x165   :  { %v543_v4 = vpop.f32.mrf.mxu1 }
 0x166   :  { %v544_v5 = vadd.f32 %v543_v4, %v454_v3  ;;  %v2028_v4 = vld [vmem:[#allocation2 + $0x44] sm:$0xf] }
 0x168   :  { %v609_v6 = vpack.c.bf16 %v544_v5, %v542_v26  ;;  %v2033_v26 = vld [vmem:[#allocation2 + $0x64] sm:$0xf0]  ;;  %v1880_v5 = vld [vmem:[#allocation2 + $0x48] sm:$0xf0] }
 0x169   :  { %792 = vmatmul.bf16.gmra.mxu2 %v1863_v53  ;;  %v1895_v3 = vor.u32 %v2033_v26, %v1894_v24 }
 0x16c   :  { %v457_v7 = vpop.f32.mrf.mxu0 }
 0x16d   :  { %v546_v8 = vpop.f32.mrf.mxu1 }
 0x16e   :  { %v547_v11 = vadd.f32 %v546_v8, %v457_v7  ;;  %v1902_v7 = vld [vmem:[#allocation2 + $0x70] sm:$0xf]  ;;  %v2035_v8 = vld [vmem:[#allocation2 + $0x74] sm:$0xf0] }
 0x174   :  { %v459_v13 = vpop.f32.mrf.mxu0 }
 0x175   :  { %v548_v9 = vpop.f32.mrf.mxu1 }
 0x176   :  { %v549_v44 = vadd.f32 %v548_v9, %v459_v13  ;;  %v2030_v13 = vld [vmem:[#allocation2 + $0x54] sm:$0xf]  ;;  %v1888_v9 = vld [vmem:[#allocation2 + $0x58] sm:$0xf0] }
 0x178   :  { %v610_v46 = vpack.c.bf16 %v549_v44, %v547_v11  ;;  %v1903_v11 = vor.u32 %v2035_v8, %v1902_v7  ;;  %v2040_v7 = vld [vmem:[#allocation2 + $0xa4] sm:$0xf]  ;;  %v1928_v8 = vld [vmem:[#allocation2 + $0xa8] sm:$0xf0] }
 0x179   :  { %797 = vmatmul.bf16.gmra.mxu2 %v1871_v0 }
 0x17c   :  { %v462_v10 = vpop.f32.mrf.mxu0 }
 0x17d   :  { %v551_v12 = vpop.f32.mrf.mxu1 }
 0x17e   :  { %v552_v43 = vadd.f32 %v551_v12, %v462_v10  ;;  %v1891_v10 = vor.u32 %v2030_v13, %v1888_v9  ;;  %v1910_v12 = vld [vmem:[#allocation2 + $0x80] sm:$0xf] }
 0x184   :  { %v464_v14 = vpop.f32.mrf.mxu0 }
 0x185   :  { %v553_v15 = vpop.f32.mrf.mxu1 }
 0x186   :  { %v554_v40 = vadd.f32 %v553_v15, %v464_v14  ;;  %v2037_v14 = vld [vmem:[#allocation2 + $0x84] sm:$0xf0] }
 0x187   :  { %v1911_v15 = vor.u32 %v2037_v14, %v1910_v12  ;;  %v1931_v14 = vor.u32 %v2040_v7, %v1928_v8 }
 0x188   :  { %v611_v45 = vpack.c.bf16 %v554_v40, %v552_v43 }
 0x189   :  { %802 = vmatmul.bf16.gmra.mxu2 %v1879_v1 }
 0x18c   :  { %v467_v16 = vpop.f32.mrf.mxu0 }
 0x18d   :  { %v556_v17 = vpop.f32.mrf.mxu1 }
 0x18e   :  { %v557_v35 = vadd.f32 %v556_v17, %v467_v16  ;;  %v2032_v16 = vld [vmem:[#allocation2 + $0x64] sm:$0xf]  ;;  %v1896_v17 = vld [vmem:[#allocation2 + $0x68] sm:$0xf0] }
 0x194   :  { %v469_v18 = vpop.f32.mrf.mxu0 }
 0x195   :  { %v558_v19 = vpop.f32.mrf.mxu1 }
 0x196   :  { %v559_v32 = vadd.f32 %v558_v19, %v469_v18  ;;  %v1899_v19 = vor.u32 %v2032_v16, %v1896_v17 }
 0x198   :  { %v612_v41 = vpack.c.bf16 %v559_v32, %v557_v35  ;;  %v1926_v32 = vld [vmem:[#allocation2 + $0xa0] sm:$0xf] }
 0x199   :  { %807 = vmatmul.bf16.gmra.mxu2 %v1887_v57 }
 0x19c   :  { %v472_v20 = vpop.f32.mrf.mxu0 }
 0x19d   :  { %v561_v22 = vpop.f32.mrf.mxu1 }
 0x19e   :  { %v562_v30 = vadd.f32 %v561_v22, %v472_v20  ;;  %v1918_v22 = vld [vmem:[#allocation2 + $0x90] sm:$0xf] }
 0x19f   :  { %v1919_v25 = vor.u32 %v2039_v23, %v1918_v22 }
 0x1a4   :  { %v474_v28 = vpop.f32.mrf.mxu0 }
 0x1a5   :  { %v563_v29 = vpop.f32.mrf.mxu1 }
 0x1a6   :  { %v564_v31 = vadd.f32 %v563_v29, %v474_v28  ;;  %v1904_v28 = vld [vmem:[#allocation2 + $0x78] sm:$0xf0] }
 0x1a8   :  { %v613_v33 = vpack.c.bf16 %v564_v31, %v562_v30  ;;  %v1907_v30 = vor.u32 %v2034_v27, %v1904_v28 }
 0x1a9   :  { %812 = vmatmul.bf16.gmra.mxu2 %v1895_v3 }
 0x1aa   :  { %863 = vmatpush.bf16.msra.mxu3 %v613_v33  ;;  %v2041_v33 = vld [vmem:[#allocation2 + $0xa4] sm:$0xf0] }
 0x1ab   :  { %v1927_v35 = vor.u32 %v2041_v33, %v1926_v32 }
 0x1ae   :  { %864 = vmatpush.bf16.msra.mxu3 %v612_v41  ;;  %v1915_v41 = vor.u32 %v2036_v36, %v1912_v38 }
 0x1b2   :  { %865 = vmatpush.bf16.msra.mxu3 %v611_v45 }
 0x1b6   :  { %866 = vmatpush.bf16.msra.mxu3 %v610_v46  ;;  %v2566_v46 = vld [vmem:[%s2865_s4] ss:$0 sm:$0xff] }
 0x1b9   :  { %817 = vmatmul.bf16.gmra.mxu2 %v1903_v11 }
 0x1ba   :  { %867 = vmatpush.bf16.msra.mxu3 %v609_v6  ;;  %v1883_v6 = vor.u32 %v2028_v4, %v1880_v5 }
 0x1be   :  { %868 = vmatpush.bf16.msra.mxu3 %v608_v2  ;;  %v1872_v2 = vld [vmem:[#allocation2 + $0x38] sm:$0xf0] }
 0x1c2   :  { %869 = vmatpush.bf16.msra.mxu3 %v607_v47  ;;  %v2024_v47 = vld [vmem:[#allocation2 + $0x24] sm:$0xf] }
 0x1c3   :  { %v1867_v37 = vor.u32 %v2024_v47, %v1864_v34 }
 0x1c6   :  { %870 = vmatpush.bf16.msra.mxu3 %v606_v58  ;;  %v2026_v58 = vld [vmem:[#allocation2 + $0x34] sm:$0xf] }
 0x1c7   :  { %v1875_v21 = vor.u32 %v2026_v58, %v1872_v2  ;;  %v1942_v58 = vld [vmem:[#allocation2 + $0xc0] sm:$0xf]  ;;  %v2045_v2 = vld [vmem:[#allocation2 + $0xc4] sm:$0xf0] }
 0x1c8   :  { %v1943_v3 = vor.u32 %v2045_v2, %v1942_v58 }
 0x1c9   :  { %871 = vmatmul.bf16.vlgmr.msra.gmra.mxu3 %v1851_v56  ;;  %822 = vmatmul.bf16.gmra.mxu2 %v1911_v15  ;;  %v2038_v56 = vld [vmem:[#allocation2 + $0x94] sm:$0xf] }
 0x1ca   :  { %v1923_v50 = vor.u32 %v2038_v56, %v1920_v59 }
 0x1cc   :  { %v783_v18 = vpop.f32.mrf.mxu2 }
 0x1d4   :  { %v785_v20 = vpop.f32.mrf.mxu2 }
 0x1d9   :  { %876 = vmatmul.bf16.gmra.mxu3 %v1859_v62  ;;  %827 = vmatmul.bf16.gmra.mxu2 %v1919_v25 }
 0x1dc   :  { %v788_v29 = vpop.f32.mrf.mxu2 }
 0x1e4   :  { %v790_v31 = vpop.f32.mrf.mxu2 }
 0x1e9   :  { %881 = vmatmul.bf16.gmra.mxu3 %v1867_v37  ;;  %832 = vmatmul.bf16.gmra.mxu2 %v1927_v35 }
 0x1ec   :  { %v2554_v40 = vpop.f32.mrf.mxu2 }
 0x1f4   :  { %v2561_v44 = vpop.f32.mrf.mxu2 }
 0x1f9   :  { %886 = vmatmul.bf16.gmra.mxu3 %v1875_v21  ;;  %837 = vmatmul.bf16.gmra.mxu2 %v1935_v54 }
 0x1fc   :  { %v2573_v60 = vpop.f32.mrf.mxu2 }
 0x204   :  { %v2580_v39 = vpop.f32.mrf.mxu2 }
 0x209   :  { %891 = vmatmul.bf16.gmra.mxu3 %v1883_v6  ;;  %842 = vmatmul.bf16.gmra.mxu2 %v1943_v3 }
 0x20c   :  { %v2587_v9 = vpop.f32.mrf.mxu2 }
 0x214   :  { %v2594_v32 = vpop.f32.mrf.mxu2 }
 0x219   :  { %896 = vmatmul.bf16.gmra.mxu3 %v1891_v10 }
 0x21c   :  { %v2604_v2 = vpop.f32.mrf.mxu2 }
 0x229   :  { %901 = vmatmul.bf16.gmra.mxu3 %v1899_v19 }
 0x239   :  { %906 = vmatmul.bf16.gmra.mxu3 %v1907_v30 }
 0x249   :  { %911 = vmatmul.bf16.gmra.mxu3 %v1915_v41 }
 0x24c   :  { %v872_v43 = vpop.f32.mrf.mxu3 }
 0x24d   :  { %v873_v45 = vadd.f32 %v872_v43, %v783_v18  ;;  %v1950_v43 = vld [vmem:[#allocation2 + $0xd0] sm:$0xf] }
 0x24f   :  { %v956_v53 = vmul.f32 %v2559_v42, %v873_v45  ;;  %v2047_v45 = vld [vmem:[#allocation2 + $0xd4] sm:$0xf0] }
 0x250   :  { %v1951_v56 = vor.u32 %v2047_v45, %v1950_v43 }
 0x251   :  { %v2570_v55 = vadd.f32 %v2566_v46, %v956_v53 }
 0x252   :  { %847 = vmatmul.bf16.gmra.mxu2 %v1951_v56 }
 0x253   :  { %v1056_v63 = vand.u32 2147483647, %v2570_v55  ;;  %v1024_v33 = vmax.f32 %v2570_v55, 0.0 }
 0x254   :  { %v874_v0 = vpop.f32.mrf.mxu3 }
 0x255   :  { %v1088_v61 = vsub.f32 0.0, %v1056_v63  ;;  %v875_v62 = vadd.f32 %v874_v0, %v785_v20 }
 0x257   :  { %v1120_v52 = vmul.f32 1.442695, %v1088_v61  ;;  %v957_v1 = vmul.f32 %v2559_v42, %v875_v62 }
 0x259   :  { %2157 = vpow2.f32 %v1120_v52  ;;  %v2577_v47 = vadd.f32 %v2566_v46, %v957_v1  ;;  %916 = vmatmul.bf16.gmra.mxu3 %v1923_v50  ;;  %v2042_v52 = vld [vmem:[#allocation2 + $0xb4] sm:$0xf]  ;;  %v1936_v1 = vld [vmem:[#allocation2 + $0xb8] sm:$0xf0] }
 0x25b   :  { %v1057_v34 = vand.u32 2147483647, %v2577_v47 }
 0x25c   :  { %v877_v37 = vpop.f32.mrf.mxu3 }
 0x25d   :  { %v1089_v49 = vsub.f32 0.0, %v1057_v34  ;;  %v878_v57 = vadd.f32 %v877_v37, %v788_v29 }
 0x25f   :  { %v2158_v21 = vpop.eup %2157  ;;  %v1122_v24 = vmul.f32 1.442695, %v1089_v49  ;;  %v958_v26 = vmul.f32 %v2559_v42, %v878_v57 }
 0x260   :  { %v1184_v4 = vadd.f32 1.0, %v2158_v21  ;;  %v1187_v6 = vmul.f32 -0.5, %v2158_v21  ;;  %v1190_v17 = vand.u32 2147483647, %v2158_v21 }
 0x261   :  { %2159 = vpow2.f32 %v1122_v24  ;;  %v2584_v5 = vadd.f32 %v2566_v46, %v958_v26  ;;  %v1939_v26 = vor.u32 %v2042_v52, %v1936_v1 }
 0x262   :  { %2161 = vlog2.f32 %v1184_v4  ;;  %v1188_v15 = vadd.f32 1.0, %v1187_v6  ;;  %vm1191_vm0 = vcmp.lt.f32.partialorder %v1190_v17, 0.0004427343 }
 0x263   :  { %v1058_v11 = vand.u32 2147483647, %v2584_v5 }
 0x264   :  { %v879_v13 = vpop.f32.mrf.mxu3  ;;  %v1189_v28 = vmul.f32 %v2158_v21, %v1188_v15 }
 0x265   :  { %v1090_v10 = vsub.f32 0.0, %v1058_v11  ;;  %v880_v12 = vadd.f32 %v879_v13, %v790_v31 }
 0x267   :  { %v2160_v16 = vpop.eup %2159  ;;  %v1124_v18 = vmul.f32 1.442695, %v1090_v10  ;;  %v959_v19 = vmul.f32 %v2559_v42, %v880_v12 }
 0x268   :  { %v2162_v20 = vpop.eup %2161  ;;  %v1193_v22 = vadd.f32 1.0, %v2160_v16  ;;  %v1196_v25 = vmul.f32 -0.5, %v2160_v16  ;;  %v1199_v41 = vand.u32 2147483647, %v2160_v16 }
 0x269   :  { %v1186_v23 = vmul.f32 0.6931472, %v2162_v20  ;;  %2163 = vpow2.f32 %v1124_v18  ;;  %v2591_v27 = vadd.f32 %v2566_v46, %v959_v19  ;;  %921 = vmatmul.bf16.gmra.mxu3 %v1931_v14  ;;  %v1026_v19 = vmax.f32 %v2584_v5, 0.0 }
 0x26a   :  { %2165 = vlog2.f32 %v1193_v22  ;;  %v1197_v35 = vadd.f32 1.0, %v1196_v25  ;;  %vm1200_vm1 = vcmp.lt.f32.partialorder %v1199_v41, 0.0004427343  ;;  %v2614_v22 = vpop.f32.mrf.mxu2 }
 0x26b   :  { %v1059_v29 = vand.u32 2147483647, %v2591_v27  ;;  %v1192_v30 = vsel %vm1191_vm0, %v1189_v28, %v1186_v23  ;;  %v1027_v56 = vmax.f32 %v2591_v27, 0.0 }
 0x26c   :  { %v882_v31 = vpop.f32.mrf.mxu3  ;;  %v1472_v51 = vadd.f32 %v1192_v30, %v1024_v33  ;;  %v1198_v62 = vmul.f32 %v2160_v16, %v1197_v35  ;;  %v1958_v33 = vld [vmem:[#allocation2 + $0xe0] sm:$0xf]  ;;  %v2049_v35 = vld [vmem:[#allocation2 + $0xe4] sm:$0xf0] }
 0x26d   :  { %v1091_v36 = vsub.f32 0.0, %v1059_v29  ;;  %v883_v38 = vadd.f32 %v882_v31, %v2554_v40  ;;  %v1025_v40 = vmax.f32 %v2577_v47, 0.0  ;;  %v1959_v43 = vor.u32 %v2049_v35, %v1958_v33 }
 0x26f   :  { %v2164_v48 = vpop.eup %2163  ;;  %v1126_v53 = vmul.f32 1.442695, %v1091_v36  ;;  %v960_v54 = vmul.f32 %v2559_v42, %v883_v38  ;;  %852 = vmatmul.bf16.gmra.mxu2 %v1959_v43 }
 0x270   :  { %v2166_v59 = vpop.eup %2165  ;;  %v1202_v63 = vadd.f32 1.0, %v2164_v48  ;;  %v1205_v0 = vmul.f32 -0.5, %v2164_v48  ;;  %v1208_v3 = vand.u32 2147483647, %v2164_v48 }
 0x271   :  { %v1195_v61 = vmul.f32 0.6931472, %v2166_v59  ;;  %2167 = vpow2.f32 %v1126_v53  ;;  %v2600_v50 = vadd.f32 %v2566_v46, %v960_v54  ;;  %v1944_v59 = vld [vmem:[#allocation2 + $0xc8] sm:$0xf0] }
 0x272   :  { %2169 = vlog2.f32 %v1202_v63  ;;  %v1206_v57 = vadd.f32 1.0, %v1205_v0  ;;  %vm1209_vm2 = vcmp.lt.f32.partialorder %v1208_v3, 0.0004427343 }
 0x273   :  { %2171 = vtanh.f32 %v1472_v51  ;;  %v1201_v34 = vsel %vm1200_vm1, %v1198_v62, %v1195_v61  ;;  %v1060_v37 = vand.u32 2147483647, %v2600_v50 }
 0x274   :  { %v1473_v49 = vadd.f32 %v1201_v34, %v1025_v40  ;;  %v884_v58 = vpop.f32.mrf.mxu3  ;;  %v1207_v11 = vmul.f32 %v2164_v48, %v1206_v57 }
 0x275   :  { %v1092_v21 = vsub.f32 0.0, %v1060_v37  ;;  %v885_v24 = vadd.f32 %v884_v58, %v2561_v44 }
 0x276   :  { %2173 = vtanh.f32 %v1473_v49  ;;  %v2625_v49 = vpop.f32.mrf.mxu2 }
 0x277   :  { %v2168_v4 = vpop.eup %2167  ;;  %v1128_v6 = vmul.f32 1.442695, %v1092_v21  ;;  %v961_v7 = vmul.f32 %v2559_v42, %v885_v24 }
 0x278   :  { %v2170_v8 = vpop.eup %2169  ;;  %v1211_v13 = vadd.f32 1.0, %v2168_v4  ;;  %v1214_v14 = vmul.f32 -0.5, %v2168_v4  ;;  %v1217_v31 = vand.u32 2147483647, %v2168_v4 }
 0x279   :  { %v2172_v10 = vpop.eup %2171  ;;  %v1204_v12 = vmul.f32 0.6931472, %v2170_v8  ;;  %2175 = vpow2.f32 %v1128_v6  ;;  %v2609_v15 = vadd.f32 %v2566_v46, %v961_v7  ;;  %926 = vmatmul.bf16.gmra.mxu3 %v1939_v26 }
 0x27a   :  { %2177 = vlog2.f32 %v1211_v13  ;;  %v1536_v18 = vmul.f32 %v2172_v10, %v2570_v55  ;;  %v1215_v25 = vadd.f32 1.0, %v1214_v14  ;;  %vm1218_vm3 = vcmp.lt.f32.partialorder %v1217_v31, 0.0004427343 }
 0x27b   :  { %v1210_v44 = vsel %vm1209_vm2, %v1207_v11, %v1204_v12  ;;  %v1061_v16 = vand.u32 2147483647, %v2609_v15  ;;  %v1028_v12 = vmax.f32 %v2600_v50, 0.0 }
 0x27c   :  { %v2174_v17 = vpop.eup %2173  ;;  %v887_v20 = vpop.f32.mrf.mxu3  ;;  %v1474_v30 = vadd.f32 %v1210_v44, %v1026_v19 }
 0x27d   :  { %v1537_v23 = vmul.f32 %v2174_v17, %v2577_v47  ;;  %v1093_v28 = vsub.f32 0.0, %v1061_v16  ;;  %v888_v29 = vadd.f32 %v887_v20, %v2573_v60  ;;  %v1216_v47 = vmul.f32 %v2168_v4, %v1215_v25  ;;  %v2044_v60 = vld [vmem:[#allocation2 + $0xc4] sm:$0xf]  ;;  %v2051_v25 = vld [vmem:[#allocation2 + $0xf4] sm:$0xf0] }
 0x27e   :  { %v1947_v34 = vor.u32 %v2044_v60, %v1944_v59 }
 0x27f   :  { %v2176_v36 = vpop.eup %2175  ;;  %v2055_v38 = vpack.c.bf16 %v1537_v23, %v1536_v18  ;;  %v1130_v41 = vmul.f32 1.442695, %v1093_v28  ;;  %v962_v55 = vmul.f32 %v2559_v42, %v888_v29  ;;  %v1966_v23 = vld [vmem:[#allocation2 + $0xf0] sm:$0xf] }
 0x280   :  { %v2178_v45 = vpop.eup %2177  ;;  %v1220_v48 = vadd.f32 1.0, %v2176_v36  ;;  %v1223_v51 = vmul.f32 -0.5, %v2176_v36  ;;  %v1226_v37 = vand.u32 2147483647, %v2176_v36  ;;  %v1967_v33 = vor.u32 %v2051_v25, %v1966_v23 }
 0x281   :  { %2056 = vst [vmem:[#allocation8] sm:$0xff] %v2055_v38   ;;  %v1213_v53 = vmul.f32 0.6931472, %v2178_v45  ;;  %2179 = vpow2.f32 %v1130_v41  ;;  %v2620_v54 = vadd.f32 %v2566_v46, %v962_v55  ;;  %v2046_v41 = vld [vmem:[#allocation2 + $0xd4] sm:$0xf]  ;;  %v1029_v55 = vmax.f32 %v2609_v15, 0.0 }
 0x282   :  { %2181 = vlog2.f32 %v1220_v48  ;;  %v1224_v62 = vadd.f32 1.0, %v1223_v51  ;;  %vm1227_vm4 = vcmp.lt.f32.partialorder %v1226_v37, 0.0004427343  ;;  %857 = vmatmul.bf16.gmra.mxu2 %v1967_v33  ;;  %v1952_v45 = vld [vmem:[#allocation2 + $0xd8] sm:$0xf0] }
 0x283   :  { %2183 = vtanh.f32 %v1474_v30  ;;  %v1219_v63 = vsel %vm1218_vm3, %v1216_v47, %v1213_v53  ;;  %v1062_v0 = vand.u32 2147483647, %v2620_v54  ;;  %v1955_v59 = vor.u32 %v2046_v41, %v1952_v45 }
 0x284   :  { %v1475_v61 = vadd.f32 %v1219_v63, %v1027_v56  ;;  %v889_v52 = vpop.f32.mrf.mxu3  ;;  %v1225_v26 = vmul.f32 %v2176_v36, %v1224_v62  ;;  %v2637_v36 = vpop.f32.mrf.mxu2 }
 0x285   :  { %v1094_v40 = vsub.f32 0.0, %v1062_v0  ;;  %v890_v1 = vadd.f32 %v889_v52, %v2580_v39 }
 0x286   :  { %2185 = vtanh.f32 %v1475_v61 }
 0x287   :  { %v2180_v57 = vpop.eup %2179  ;;  %v1132_v58 = vmul.f32 1.442695, %v1094_v40  ;;  %v963_v21 = vmul.f32 %v2559_v42, %v890_v1 }
 0x288   :  { %v2182_v24 = vpop.eup %2181  ;;  %v1229_v3 = vadd.f32 1.0, %v2180_v57  ;;  %v1232_v7 = vmul.f32 -0.5, %v2180_v57  ;;  %v1235_v20 = vand.u32 2147483647, %v2180_v57 }
 0x289   :  { %v2184_v4 = vpop.eup %2183  ;;  %v1222_v6 = vmul.f32 0.6931472, %v2182_v24  ;;  %2187 = vpow2.f32 %v1132_v58  ;;  %v2629_v8 = vadd.f32 %v2566_v46, %v963_v21  ;;  %931 = vmatmul.bf16.gmra.mxu3 %v1947_v34 }
 0x28a   :  { %2189 = vlog2.f32 %v1229_v3  ;;  %v1538_v10 = vmul.f32 %v2184_v4, %v2584_v5  ;;  %v1233_v16 = vadd.f32 1.0, %v1232_v7  ;;  %vm1236_vm5 = vcmp.lt.f32.partialorder %v1235_v20, 0.0004427343 }
 0x28b   :  { %v1228_v39 = vsel %vm1227_vm4, %v1225_v26, %v1222_v6  ;;  %v1063_v11 = vand.u32 2147483647, %v2629_v8  ;;  %v1030_v4 = vmax.f32 %v2620_v54, 0.0 }
 0x28c   :  { %v2186_v13 = vpop.eup %2185  ;;  %v892_v14 = vpop.f32.mrf.mxu3  ;;  %v1476_v19 = vadd.f32 %v1228_v39, %v1028_v12  ;;  %v1234_v38 = vmul.f32 %v2180_v57, %v1233_v16 }
 0x28d   :  { %v1539_v44 = vmul.f32 %v2186_v13, %v2591_v27  ;;  %v1095_v17 = vsub.f32 0.0, %v1063_v11  ;;  %v893_v18 = vadd.f32 %v892_v14, %v2587_v9 }
 0x28f   :  { %v2188_v28 = vpop.eup %2187  ;;  %v2060_v29 = vpack.c.bf16 %v1539_v44, %v1538_v10  ;;  %v1134_v30 = vmul.f32 1.442695, %v1095_v17  ;;  %v964_v31 = vmul.f32 %v2559_v42, %v893_v18 }
 0x290   :  { %v2190_v5 = vpop.eup %2189  ;;  %v1238_v35 = vadd.f32 1.0, %v2188_v28  ;;  %v1241_v43 = vmul.f32 -0.5, %v2188_v28  ;;  %v1244_v61 = vand.u32 2147483647, %v2188_v28 }
 0x291   :  { %2132 = vst [vmem:[#allocation8 + $0x8] sm:$0xff] %v2060_v29   ;;  %v1231_v27 = vmul.f32 0.6931472, %v2190_v5  ;;  %2191 = vpow2.f32 %v1134_v30  ;;  %v2640_v9 = vadd.f32 %v2566_v46, %v964_v31  ;;  %v1960_v29 = vld [vmem:[#allocation2 + $0xe8] sm:$0xf0] }
 0x292   :  { %2193 = vlog2.f32 %v1238_v35  ;;  %v1242_v63 = vadd.f32 1.0, %v1241_v43  ;;  %vm1245_vm6 = vcmp.lt.f32.partialorder %v1244_v61, 0.0004427343 }
 0x293   :  { %2195 = vtanh.f32 %v1476_v19  ;;  %v1237_v48 = vsel %vm1236_vm5, %v1234_v38, %v1231_v27  ;;  %v1064_v51 = vand.u32 2147483647, %v2640_v9 }
 0x294   :  { %v1477_v53 = vadd.f32 %v1237_v48, %v1029_v55  ;;  %v894_v47 = vpop.f32.mrf.mxu3  ;;  %v1243_v21 = vmul.f32 %v2188_v28, %v1242_v63  ;;  %v1031_v28 = vmax.f32 %v2629_v8, 0.0 }
 0x295   :  { %v1096_v60 = vsub.f32 0.0, %v1064_v51  ;;  %v895_v56 = vadd.f32 %v894_v47, %v2594_v32  ;;  %v2649_v32 = vpop.f32.mrf.mxu2 }
 0x296   :  { %2197 = vtanh.f32 %v1477_v53 }
 0x297   :  { %v2192_v0 = vpop.eup %2191  ;;  %v1136_v62 = vmul.f32 1.442695, %v1096_v60  ;;  %v965_v52 = vmul.f32 %v2559_v42, %v895_v56 }
 0x298   :  { %v2194_v40 = vpop.eup %2193  ;;  %v1247_v1 = vadd.f32 1.0, %v2192_v0  ;;  %v1250_v57 = vmul.f32 -0.5, %v2192_v0  ;;  %v1253_v12 = vand.u32 2147483647, %v2192_v0 }
 0x299   :  { %v2196_v34 = vpop.eup %2195  ;;  %v1240_v37 = vmul.f32 0.6931472, %v2194_v40  ;;  %2199 = vpow2.f32 %v1136_v62  ;;  %v2647_v58 = vadd.f32 %v2566_v46, %v965_v52  ;;  %936 = vmatmul.bf16.gmra.mxu3 %v1955_v59  ;;  %v1032_v52 = vmax.f32 %v2640_v9, 0.0 }
 0x29a   :  { %2201 = vlog2.f32 %v1247_v1  ;;  %v1540_v3 = vmul.f32 %v2196_v34, %v2600_v50  ;;  %v1251_v11 = vadd.f32 1.0, %v1250_v57  ;;  %vm1254_vm7 = vcmp.lt.f32.partialorder %v1253_v12, 0.0004427343  ;;  %v2050_v12 = vld [vmem:[#allocation2 + $0xf4] sm:$0xf] }
 0x29b   :  { %v1065_v24 = vand.u32 2147483647, %v2647_v58  ;;  %v1246_v6 = vsel %vm1245_vm6, %v1243_v21, %v1240_v37 }
 0x29c   :  { %v2198_v26 = vpop.eup %2197  ;;  %v897_v7 = vpop.f32.mrf.mxu3  ;;  %v1478_v16 = vadd.f32 %v1246_v6, %v1030_v4  ;;  %v1252_v23 = vmul.f32 %v2192_v0, %v1251_v11 }
 0x29d   :  { %v1541_v39 = vmul.f32 %v2198_v26, %v2609_v15  ;;  %v1097_v13 = vsub.f32 0.0, %v1065_v24  ;;  %v898_v10 = vadd.f32 %v897_v7, %v2604_v2  ;;  %v2048_v15 = vld [vmem:[#allocation2 + $0xe4] sm:$0xf]  ;;  %v2662_v35 = vpop.f32.mrf.mxu2 }
 0x29e   :  { %v1963_v41 = vor.u32 %v2048_v15, %v1960_v29 }
 0x29f   :  { %v2200_v14 = vpop.eup %2199  ;;  %v2065_v44 = vpack.c.bf16 %v1541_v39, %v1540_v3  ;;  %v1138_v17 = vmul.f32 1.442695, %v1097_v13  ;;  %v966_v18 = vmul.f32 %v2559_v42, %v898_v10 }
 0x2a0   :  { %v2202_v19 = vpop.eup %2201  ;;  %v1256_v20 = vadd.f32 1.0, %v2200_v14  ;;  %v1259_v2 = vmul.f32 -0.5, %v2200_v14  ;;  %v1262_v45 = vand.u32 2147483647, %v2200_v14 }
 0x2a1   :  { %2133 = vst [vmem:[#allocation8 + $0x10] sm:$0xff] %v2065_v44   ;;  %v1249_v50 = vmul.f32 0.6931472, %v2202_v19  ;;  %2203 = vpow2.f32 %v1138_v17  ;;  %v2658_v25 = vadd.f32 %v2566_v46, %v966_v18  ;;  %v1968_v44 = vld [vmem:[#allocation2 + $0xf8] sm:$0xf0] }
 0x2a2   :  { %2205 = vlog2.f32 %v1256_v20  ;;  %v1260_v55 = vadd.f32 1.0, %v1259_v2  ;;  %vm1263_vm8 = vcmp.lt.f32.partialorder %v1262_v45, 0.0004427343 }
 0x2a3   :  { %2207 = vtanh.f32 %v1478_v16  ;;  %v1255_v30 = vsel %vm1254_vm7, %v1252_v23, %v1249_v50  ;;  %v1066_v31 = vand.u32 2147483647, %v2658_v25  ;;  %v1971_v23 = vor.u32 %v2050_v12, %v1968_v44 }
 0x2a4   :  { %v1479_v33 = vadd.f32 %v1255_v30, %v1031_v28  ;;  %v899_v5 = vpop.f32.mrf.mxu3  ;;  %v1261_v0 = vmul.f32 %v2200_v14, %v1260_v55 }
 0x2a5   :  { %v1098_v27 = vsub.f32 0.0, %v1066_v31  ;;  %v900_v38 = vadd.f32 %v899_v5, %v2614_v22  ;;  %v2674_v26 = vpop.f32.mrf.mxu2 }
 0x2a6   :  { %2209 = vtanh.f32 %v1479_v33 }
 0x2a7   :  { %v2204_v43 = vpop.eup %2203  ;;  %v1140_v48 = vmul.f32 1.442695, %v1098_v27  ;;  %v967_v51 = vmul.f32 %v2559_v42, %v900_v38 }
 0x2a8   :  { %v2206_v53 = vpop.eup %2205  ;;  %v1265_v47 = vadd.f32 1.0, %v2204_v43  ;;  %v1268_v59 = vmul.f32 -0.5, %v2204_v43  ;;  %v1271_v24 = vand.u32 2147483647, %v2204_v43 }
 0x2a9   :  { %v2208_v60 = vpop.eup %2207  ;;  %v1258_v56 = vmul.f32 0.6931472, %v2206_v53  ;;  %2211 = vpow2.f32 %v1140_v48  ;;  %v2667_v63 = vadd.f32 %v2566_v46, %v967_v51  ;;  %941 = vmatmul.bf16.gmra.mxu3 %v1963_v41  ;;  %v1034_v51 = vmax.f32 %v2658_v25, 0.0 }
 0x2aa   :  { %2213 = vlog2.f32 %v1265_v47  ;;  %v1542_v62 = vmul.f32 %v2208_v60, %v2620_v54  ;;  %v1269_v37 = vadd.f32 1.0, %v1268_v59  ;;  %vm1272_vm9 = vcmp.lt.f32.partialorder %v1271_v24, 0.0004427343 }
 0x2ab   :  { %v1067_v22 = vand.u32 2147483647, %v2667_v63  ;;  %v1264_v40 = vsel %vm1263_vm8, %v1261_v0, %v1258_v56 }
 0x2ac   :  { %v2210_v61 = vpop.eup %2209  ;;  %v902_v1 = vpop.f32.mrf.mxu3  ;;  %v1480_v6 = vadd.f32 %v1264_v40, %v1032_v52  ;;  %v1270_v10 = vmul.f32 %v2204_v43, %v1269_v37 }
 0x2ad   :  { %v1543_v34 = vmul.f32 %v2210_v61, %v2629_v8  ;;  %v1099_v57 = vsub.f32 0.0, %v1067_v22  ;;  %v903_v21 = vadd.f32 %v902_v1, %v2625_v49  ;;  %v1033_v49 = vmax.f32 %v2647_v58, 0.0  ;;  %v2684_v5 = vpop.f32.mrf.mxu2 }
 0x2af   :  { %v2212_v3 = vpop.eup %2211  ;;  %v2070_v4 = vpack.c.bf16 %v1543_v34, %v1542_v62  ;;  %v1142_v7 = vmul.f32 1.442695, %v1099_v57  ;;  %v968_v39 = vmul.f32 %v2559_v42, %v903_v21 }
 0x2b0   :  { %v2214_v54 = vpop.eup %2213  ;;  %v1274_v11 = vadd.f32 1.0, %v2212_v3  ;;  %v1277_v14 = vmul.f32 -0.5, %v2212_v3  ;;  %v1280_v2 = vand.u32 2147483647, %v2212_v3 }
 0x2b1   :  { %2134 = vst [vmem:[#allocation8 + $0x18] sm:$0xff] %v2070_v4   ;;  %v1267_v13 = vmul.f32 0.6931472, %v2214_v54  ;;  %2215 = vpow2.f32 %v1142_v7  ;;  %v2678_v8 = vadd.f32 %v2566_v46, %v968_v39 }
 0x2b2   :  { %2217 = vlog2.f32 %v1274_v11  ;;  %v1278_v15 = vadd.f32 1.0, %v1277_v14  ;;  %vm1281_vm10 = vcmp.lt.f32.partialorder %v1280_v2, 0.0004427343 }
 0x2b3   :  { %2219 = vtanh.f32 %v1480_v6  ;;  %v1273_v16 = vsel %vm1272_vm9, %v1270_v10, %v1267_v13  ;;  %v1068_v17 = vand.u32 2147483647, %v2678_v8 }
 0x2b4   :  { %v1481_v18 = vadd.f32 %v1273_v16, %v1033_v49  ;;  %v904_v19 = vpop.f32.mrf.mxu3 }
 0x2b5   :  { %v1100_v20 = vsub.f32 0.0, %v1068_v17  ;;  %v905_v50 = vadd.f32 %v904_v19, %v2637_v36  ;;  %v1279_v36 = vmul.f32 %v2212_v3, %v1278_v15  ;;  %v2699_v24 = vpop.f32.mrf.mxu2  ;;  %v1036_v15 = vmax.f32 %v2678_v8, 0.0 }
 0x2b6   :  { %2221 = vtanh.f32 %v1481_v18 }
 0x2b7   :  { %v2216_v28 = vpop.eup %2215  ;;  %v1144_v29 = vmul.f32 1.442695, %v1100_v20  ;;  %v969_v30 = vmul.f32 %v2559_v42, %v905_v50 }
 0x2b8   :  { %v2218_v31 = vpop.eup %2217  ;;  %v1283_v33 = vadd.f32 1.0, %v2216_v28  ;;  %v1286_v41 = vmul.f32 -0.5, %v2216_v28  ;;  %v1289_v22 = vand.u32 2147483647, %v2216_v28 }
 0x2b9   :  { %v2220_v27 = vpop.eup %2219  ;;  %v1276_v38 = vmul.f32 0.6931472, %v2218_v31  ;;  %2223 = vpow2.f32 %v1144_v29  ;;  %v2687_v55 = vadd.f32 %v2566_v46, %v969_v30  ;;  %946 = vmatmul.bf16.gmra.mxu3 %v1971_v23 }
 0x2ba   :  { %2225 = vlog2.f32 %v1283_v33  ;;  %v1544_v48 = vmul.f32 %v2220_v27, %v2640_v9  ;;  %v1287_v56 = vadd.f32 1.0, %v1286_v41  ;;  %vm1290_vm11 = vcmp.lt.f32.partialorder %v1289_v22, 0.0004427343 }
 0x2bb   :  { %v1069_v43 = vand.u32 2147483647, %v2687_v55  ;;  %v1282_v53 = vsel %vm1281_vm10, %v1279_v36, %v1276_v38 }
 0x2bc   :  { %v2222_v45 = vpop.eup %2221  ;;  %v907_v47 = vpop.f32.mrf.mxu3  ;;  %v1482_v52 = vadd.f32 %v1282_v53, %v1034_v51  ;;  %v1288_v57 = vmul.f32 %v2216_v28, %v1287_v56 }
 0x2bd   :  { %v1545_v60 = vmul.f32 %v2222_v45, %v2647_v58  ;;  %v1101_v59 = vsub.f32 0.0, %v1069_v43  ;;  %v908_v0 = vadd.f32 %v907_v47, %v2649_v32  ;;  %v1035_v58 = vmax.f32 %v2667_v63, 0.0  ;;  %v2710_v29 = vpop.f32.mrf.mxu2 }
 0x2bf   :  { %v2224_v61 = vpop.eup %2223  ;;  %v2075_v62 = vpack.c.bf16 %v1545_v60, %v1544_v48  ;;  %v1146_v40 = vmul.f32 1.442695, %v1101_v59  ;;  %v970_v1 = vmul.f32 %v2559_v42, %v908_v0 }
 0x2c0   :  { %v2226_v34 = vpop.eup %2225  ;;  %v1292_v37 = vadd.f32 1.0, %v2224_v61  ;;  %v1295_v32 = vmul.f32 -0.5, %v2224_v61  ;;  %v1298_v10 = vand.u32 2147483647, %v2224_v61 }
 0x2c1   :  { %2135 = vst [vmem:[#allocation8 + $0x20] sm:$0xff] %v2075_v62   ;;  %v1285_v9 = vmul.f32 0.6931472, %v2226_v34  ;;  %2227 = vpow2.f32 %v1146_v40  ;;  %v2696_v21 = vadd.f32 %v2566_v46, %v970_v1 }
 0x2c2   :  { %2229 = vlog2.f32 %v1292_v37  ;;  %v1296_v11 = vadd.f32 1.0, %v1295_v32  ;;  %vm1299_vm12 = vcmp.lt.f32.partialorder %v1298_v10, 0.0004427343 }
 0x2c3   :  { %2231 = vtanh.f32 %v1482_v52  ;;  %v1291_v3 = vsel %vm1290_vm11, %v1288_v57, %v1285_v9  ;;  %v1070_v4 = vand.u32 2147483647, %v2696_v21 }
 0x2c4   :  { %v1483_v6 = vadd.f32 %v1291_v3, %v1035_v58  ;;  %v909_v7 = vpop.f32.mrf.mxu3  ;;  %v1297_v20 = vmul.f32 %v2224_v61, %v1296_v11  ;;  %v1038_v11 = vmax.f32 %v2696_v21, 0.0 }
 0x2c5   :  { %v1102_v39 = vsub.f32 0.0, %v1070_v4  ;;  %v910_v54 = vadd.f32 %v909_v7, %v2662_v35  ;;  %v2721_v40 = vpop.f32.mrf.mxu2 }
 0x2c6   :  { %2233 = vtanh.f32 %v1483_v6 }
 0x2c7   :  { %v2228_v13 = vpop.eup %2227  ;;  %v1148_v12 = vmul.f32 1.442695, %v1102_v39  ;;  %v971_v49 = vmul.f32 %v2559_v42, %v910_v54 }
 0x2c8   :  { %v2230_v14 = vpop.eup %2229  ;;  %v1301_v44 = vadd.f32 1.0, %v2228_v13  ;;  %v1304_v18 = vmul.f32 -0.5, %v2228_v13  ;;  %v1307_v38 = vand.u32 2147483647, %v2228_v13 }
 0x2c9   :  { %v2232_v16 = vpop.eup %2231  ;;  %v1294_v17 = vmul.f32 0.6931472, %v2230_v14  ;;  %2235 = vpow2.f32 %v1148_v12  ;;  %v2705_v19 = vadd.f32 %v2566_v46, %v971_v49 }
 0x2ca   :  { %2237 = vlog2.f32 %v1301_v44  ;;  %v1546_v23 = vmul.f32 %v2232_v16, %v2658_v25  ;;  %v1305_v31 = vadd.f32 1.0, %v1304_v18  ;;  %vm1308_vm13 = vcmp.lt.f32.partialorder %v1307_v38, 0.0004427343 }
 0x2cb   :  { %v1071_v35 = vand.u32 2147483647, %v2705_v19  ;;  %v1300_v28 = vsel %vm1299_vm12, %v1297_v20, %v1294_v17 }
 0x2cc   :  { %v2234_v50 = vpop.eup %2233  ;;  %v912_v2 = vpop.f32.mrf.mxu3  ;;  %v1484_v43 = vadd.f32 %v1300_v28, %v1036_v15  ;;  %v1306_v47 = vmul.f32 %v2228_v13, %v1305_v31 }
 0x2cd   :  { %v1547_v30 = vmul.f32 %v2234_v50, %v2667_v63  ;;  %v1103_v33 = vsub.f32 0.0, %v1071_v35  ;;  %v913_v27 = vadd.f32 %v912_v2, %v2674_v26  ;;  %v1037_v63 = vmax.f32 %v2687_v55, 0.0 }
 0x2cf   :  { %v2236_v41 = vpop.eup %2235  ;;  %v2080_v36 = vpack.c.bf16 %v1547_v30, %v1546_v23  ;;  %v1150_v45 = vmul.f32 1.442695, %v1103_v33  ;;  %v972_v48 = vmul.f32 %v2559_v42, %v913_v27 }
 0x2d0   :  { %v2238_v25 = vpop.eup %2237  ;;  %v1310_v51 = vadd.f32 1.0, %v2236_v41  ;;  %v1313_v26 = vmul.f32 -0.5, %v2236_v41  ;;  %v1316_v34 = vand.u32 2147483647, %v2236_v41 }
 0x2d1   :  { %2136 = vst [vmem:[#allocation8 + $0x28] sm:$0xff] %v2080_v36   ;;  %v1303_v53 = vmul.f32 0.6931472, %v2238_v25  ;;  %2239 = vpow2.f32 %v1150_v45  ;;  %v2716_v60 = vadd.f32 %v2566_v46, %v972_v48 }
 0x2d2   :  { %2241 = vlog2.f32 %v1310_v51  ;;  %v1314_v52 = vadd.f32 1.0, %v1313_v26  ;;  %vm1317_vm14 = vcmp.lt.f32.partialorder %v1316_v34, 0.0004427343 }
 0x2d3   :  { %2243 = vtanh.f32 %v1484_v43  ;;  %v1309_v56 = vsel %vm1308_vm13, %v1306_v47, %v1303_v53  ;;  %v1072_v59 = vand.u32 2147483647, %v2716_v60 }
 0x2d4   :  { %v1485_v0 = vadd.f32 %v1309_v56, %v1037_v63  ;;  %v914_v22 = vpop.f32.mrf.mxu3  ;;  %v1315_v7 = vmul.f32 %v2236_v41, %v1314_v52 }
 0x2d5   :  { %v1104_v61 = vsub.f32 0.0, %v1072_v59  ;;  %v915_v62 = vadd.f32 %v914_v22, %v2684_v5 }
 0x2d6   :  { %2245 = vtanh.f32 %v1485_v0 }
 0x2d7   :  { %v2240_v1 = vpop.eup %2239  ;;  %v1152_v37 = vmul.f32 1.442695, %v1104_v61  ;;  %v973_v9 = vmul.f32 %v2559_v42, %v915_v62 }
 0x2d8   :  { %v2242_v57 = vpop.eup %2241  ;;  %v1319_v58 = vadd.f32 1.0, %v2240_v1  ;;  %v1322_v4 = vmul.f32 -0.5, %v2240_v1  ;;  %v1325_v16 = vand.u32 2147483647, %v2240_v1 }
 0x2d9   :  { %v2244_v32 = vpop.eup %2243  ;;  %v1312_v3 = vmul.f32 0.6931472, %v2242_v57  ;;  %2247 = vpow2.f32 %v1152_v37  ;;  %v2725_v6 = vadd.f32 %v2566_v46, %v973_v9 }
 0x2da   :  { %2249 = vlog2.f32 %v1319_v58  ;;  %v1548_v54 = vmul.f32 %v2244_v32, %v2678_v8  ;;  %v1323_v49 = vadd.f32 1.0, %v1322_v4  ;;  %v2733_v8 = vpop.f32.mrf.mxu2  ;;  %vm1326_vm15 = vcmp.lt.f32.partialorder %v1325_v16, 0.0004427343 }
 0x2db   :  { %v1073_v5 = vand.u32 2147483647, %v2725_v6  ;;  %v1318_v13 = vsel %vm1317_vm14, %v1315_v7, %v1312_v3  ;;  %v2755_v7 = vld [vmem:[%s2864_s3] ss:$0 sm:$0xff]  ;;  %s2460_s3 = smov [#allocation8]  }
 0x2dc   :  { %v2246_v39 = vpop.eup %2245  ;;  %v917_v10 = vpop.f32.mrf.mxu3  ;;  %v1486_v20 = vadd.f32 %v1318_v13, %v1038_v11  ;;  %v1324_v2 = vmul.f32 %v2240_v1, %v1323_v49  ;;  %v1041_v13 = vmax.f32 %v2725_v6, 0.0 }
 0x2dd   :  { %v1549_v12 = vmul.f32 %v2246_v39, %v2687_v55  ;;  %v1105_v14 = vsub.f32 0.0, %v1073_v5  ;;  %v918_v44 = vadd.f32 %v917_v10, %v2699_v24  ;;  %v1039_v24 = vmax.f32 %v2705_v19, 0.0 }
 0x2df   :  { %v2248_v17 = vpop.eup %2247  ;;  %v2085_v18 = vpack.c.bf16 %v1549_v12, %v1548_v54  ;;  %v1154_v35 = vmul.f32 1.442695, %v1105_v14  ;;  %v974_v50 = vmul.f32 %v2559_v42, %v918_v44 }
 0x2e0   :  { %v2250_v23 = vpop.eup %2249  ;;  %v1328_v15 = vadd.f32 1.0, %v2248_v17  ;;  %v1331_v30 = vmul.f32 -0.5, %v2248_v17  ;;  %v1334_v48 = vand.u32 2147483647, %v2248_v17 }
 0x2e1   :  { %2137 = vst [vmem:[#allocation8 + $0x30] sm:$0xff] %v2085_v18   ;;  %v1321_v28 = vmul.f32 0.6931472, %v2250_v23  ;;  %2251 = vpow2.f32 %v1154_v35  ;;  %v2736_v55 = vadd.f32 %v2566_v46, %v974_v50 }
 0x2e2   :  { %2253 = vlog2.f32 %v1328_v15  ;;  %v1332_v43 = vadd.f32 1.0, %v1331_v30  ;;  %v2745_v22 = vpop.f32.mrf.mxu2  ;;  %vm1335_vm0 = vcmp.lt.f32.partialorder %v1334_v48, 0.0004427343 }
 0x2e3   :  { %2255 = vtanh.f32 %v1486_v20  ;;  %v1327_v31 = vsel %vm1326_vm15, %v1324_v2, %v1321_v28  ;;  %v1074_v33 = vand.u32 2147483647, %v2736_v55 }
 0x2e4   :  { %v1487_v27 = vadd.f32 %v1327_v31, %v1039_v24  ;;  %v919_v38 = vpop.f32.mrf.mxu3  ;;  %v1333_v0 = vmul.f32 %v2248_v17, %v1332_v43 }
 0x2e5   :  { %v1106_v41 = vsub.f32 0.0, %v1074_v33  ;;  %v920_v36 = vadd.f32 %v919_v38, %v2710_v29 }
 0x2e6   :  { %2257 = vtanh.f32 %v1487_v27 }
 0x2e7   :  { %v2252_v45 = vpop.eup %2251  ;;  %v1156_v25 = vmul.f32 1.442695, %v1106_v41  ;;  %v975_v51 = vmul.f32 %v2559_v42, %v920_v36  ;;  %v1040_v42 = vmax.f32 %v2716_v60, 0.0  ;;  %v1042_v36 = vmax.f32 %v2736_v55, 0.0 }
 0x2e8   :  { %v2254_v53 = vpop.eup %2253  ;;  %v1337_v47 = vadd.f32 1.0, %v2252_v45  ;;  %v1340_v56 = vmul.f32 -0.5, %v2252_v45  ;;  %v1343_v57 = vand.u32 2147483647, %v2252_v45 }
 0x2e9   :  { %v2256_v63 = vpop.eup %2255  ;;  %v1330_v26 = vmul.f32 0.6931472, %v2254_v53  ;;  %2259 = vpow2.f32 %v1156_v25  ;;  %v2743_v59 = vadd.f32 %v2566_v46, %v975_v51 }
 0x2ea   :  { %2261 = vlog2.f32 %v1337_v47  ;;  %v1550_v62 = vmul.f32 %v2256_v63, %v2696_v21  ;;  %v1341_v37 = vadd.f32 1.0, %v1340_v56  ;;  %vm1344_vm1 = vcmp.lt.f32.partialorder %v1343_v57, 0.0004427343  ;;  %v840_v16 = vpop.f32.mrf.mxu2 }
 0x2eb   :  { %v1075_v29 = vand.u32 2147483647, %v2743_v59  ;;  %v1336_v52 = vsel %vm1335_vm0, %v1333_v0, %v1330_v26 }
 0x2ec   :  { %v2258_v61 = vpop.eup %2257  ;;  %v922_v1 = vpop.f32.mrf.mxu3  ;;  %v1488_v3 = vadd.f32 %v1336_v52, %v1040_v42  ;;  %v1342_v54 = vmul.f32 %v2252_v45, %v1341_v37 }
 0x2ed   :  { %v1551_v34 = vmul.f32 %v2258_v61, %v2705_v19  ;;  %v1107_v9 = vsub.f32 0.0, %v1075_v29  ;;  %v923_v46 = vadd.f32 %v922_v1, %v2721_v40  ;;  %v2761_v40 = vld [vmem:[%s2865_s4] ss:$0 sm:$0xff]  ;;  %v1043_v1 = vmax.f32 %v2743_v59, 0.0  ;;  %s1636_s4 = sshll.u32 %s2460_s3, 4  ;;  %s1637_s4 = int_to_ptr.vmem [resolvable:$true] %s1636_s4 }
 0x2ef   :  { %v2260_v58 = vpop.eup %2259  ;;  %v2090_v32 = vpack.c.bf16 %v1551_v34, %v1550_v62  ;;  %v1158_v4 = vmul.f32 1.442695, %v1107_v9  ;;  %v976_v21 = vmul.f32 %v2755_v7, %v923_v46 }
 0x2f0   :  { %v2262_v5 = vpop.eup %2261  ;;  %v1346_v39 = vadd.f32 1.0, %v2260_v58  ;;  %v1349_v10 = vmul.f32 -0.5, %v2260_v58  ;;  %v1352_v50 = vand.u32 2147483647, %v2260_v58 }
 0x2f1   :  { %2138 = vst [vmem:[#allocation8 + $0x38] sm:$0xff] %v2090_v32   ;;  %v1339_v19 = vmul.f32 0.6931472, %v2262_v5  ;;  %2263 = vpow2.f32 %v1158_v4  ;;  %v2764_v11 = vadd.f32 %v2761_v40, %v976_v21 }
 0x2f2   :  { %2265 = vlog2.f32 %v1346_v39  ;;  %v1350_v20 = vadd.f32 1.0, %v1349_v10  ;;  %vm1353_vm2 = vcmp.lt.f32.partialorder %v1352_v50, 0.0004427343  ;;  %v843_v63 = vpop.f32.mrf.mxu2 }
 0x2f3   :  { %2267 = vtanh.f32 %v1488_v3  ;;  %v1345_v12 = vsel %vm1344_vm1, %v1342_v54, %v1339_v19  ;;  %v1076_v49 = vand.u32 2147483647, %v2764_v11 }
 0x2f4   :  { %v1489_v14 = vadd.f32 %v1345_v12, %v1041_v13  ;;  %v924_v44 = vpop.f32.mrf.mxu3  ;;  %v1351_v27 = vmul.f32 %v2260_v58, %v1350_v20 }
 0x2f5   :  { %v1108_v17 = vsub.f32 0.0, %v1076_v49  ;;  %v925_v18 = vadd.f32 %v924_v44, %v2733_v8 }
 0x2f6   :  { %2269 = vtanh.f32 %v1489_v14 }
 0x2f7   :  { %v2264_v35 = vpop.eup %2263  ;;  %v1160_v23 = vmul.f32 1.442695, %v1108_v17  ;;  %v977_v15 = vmul.f32 %v2755_v7, %v925_v18  ;;  %v1044_v18 = vmax.f32 %v2764_v11, 0.0 }
 0x2f8   :  { %v2266_v28 = vpop.eup %2265  ;;  %v1355_v2 = vadd.f32 1.0, %v2264_v35  ;;  %v1358_v31 = vmul.f32 -0.5, %v2264_v35  ;;  %v1361_v47 = vand.u32 2147483647, %v2264_v35 }
 0x2f9   :  { %v2268_v24 = vpop.eup %2267  ;;  %v1348_v30 = vmul.f32 0.6931472, %v2266_v28  ;;  %2271 = vpow2.f32 %v1160_v23  ;;  %v2771_v33 = vadd.f32 %v2761_v40, %v977_v15 }
 0x2fa   :  { %2273 = vlog2.f32 %v1355_v2  ;;  %v1552_v41 = vmul.f32 %v2268_v24, %v2716_v60  ;;  %v1359_v25 = vadd.f32 1.0, %v1358_v31  ;;  %vm1362_vm3 = vcmp.lt.f32.partialorder %v1361_v47, 0.0004427343  ;;  %v845_v54 = vpop.f32.mrf.mxu2 }
 0x2fb   :  { %v1077_v8 = vand.u32 2147483647, %v2771_v33  ;;  %v1354_v43 = vsel %vm1353_vm2, %v1351_v27, %v1348_v30 }
 0x2fc   :  { %v2270_v38 = vpop.eup %2269  ;;  %v927_v45 = vpop.f32.mrf.mxu3  ;;  %v1490_v0 = vadd.f32 %v1354_v43, %v1042_v36  ;;  %v1360_v52 = vmul.f32 %v2264_v35, %v1359_v25 }
 0x2fd   :  { %v1553_v48 = vmul.f32 %v2270_v38, %v2725_v6  ;;  %v1109_v51 = vsub.f32 0.0, %v1077_v8  ;;  %v928_v53 = vadd.f32 %v927_v45, %v2745_v22 }
 0x2ff   :  { %v2272_v26 = vpop.eup %2271  ;;  %v2095_v56 = vpack.c.bf16 %v1553_v48, %v1552_v41  ;;  %v1162_v29 = vmul.f32 1.442695, %v1109_v51  ;;  %v978_v61 = vmul.f32 %v2755_v7, %v928_v53 }
 0x300   :  { %v2274_v62 = vpop.eup %2273  ;;  %v1364_v60 = vadd.f32 1.0, %v2272_v26  ;;  %v1367_v22 = vmul.f32 -0.5, %v2272_v26  ;;  %v1370_v4 = vand.u32 2147483647, %v2272_v26 }
 0x301   :  { %2139 = vst [vmem:[#allocation8 + $0x40] sm:$0xff] %v2095_v56   ;;  %v1357_v42 = vmul.f32 0.6931472, %v2274_v62  ;;  %2275 = vpow2.f32 %v1162_v29  ;;  %v2780_v6 = vadd.f32 %v2761_v40, %v978_v61 }
 0x302   :  { %2277 = vlog2.f32 %v1364_v60  ;;  %v1368_v32 = vadd.f32 1.0, %v1367_v22  ;;  %vm1371_vm4 = vcmp.lt.f32.partialorder %v1370_v4, 0.0004427343  ;;  %v848_v48 = vpop.f32.mrf.mxu2 }
 0x303   :  { %2279 = vtanh.f32 %v1490_v0  ;;  %v1363_v34 = vsel %vm1362_vm3, %v1360_v52, %v1357_v42  ;;  %v1078_v37 = vand.u32 2147483647, %v2780_v6 }
 0x304   :  { %v1491_v9 = vadd.f32 %v1363_v34, %v1043_v1  ;;  %v929_v46 = vpop.f32.mrf.mxu3  ;;  %v1369_v14 = vmul.f32 %v2272_v26, %v1368_v32 }
 0x305   :  { %v1110_v57 = vsub.f32 0.0, %v1078_v37  ;;  %v930_v58 = vadd.f32 %v929_v46, %v840_v16 }
 0x306   :  { %2281 = vtanh.f32 %v1491_v9 }
 0x307   :  { %v2276_v3 = vpop.eup %2275  ;;  %v1164_v21 = vmul.f32 1.442695, %v1110_v57  ;;  %v979_v5 = vmul.f32 %v2755_v7, %v930_v58  ;;  %v1046_v58 = vmax.f32 %v2780_v6, 0.0 }
 0x308   :  { %v2278_v39 = vpop.eup %2277  ;;  %v1373_v19 = vadd.f32 1.0, %v2276_v3  ;;  %v1376_v12 = vmul.f32 -0.5, %v2276_v3  ;;  %v1379_v2 = vand.u32 2147483647, %v2276_v3 }
 0x309   :  { %v2280_v13 = vpop.eup %2279  ;;  %v1366_v10 = vmul.f32 0.6931472, %v2278_v39  ;;  %2283 = vpow2.f32 %v1164_v21  ;;  %v2786_v49 = vadd.f32 %v2761_v40, %v979_v5 }
 0x30a   :  { %2285 = vlog2.f32 %v1373_v19  ;;  %v1554_v17 = vmul.f32 %v2280_v13, %v2736_v55  ;;  %v1377_v23 = vadd.f32 1.0, %v1376_v12  ;;  %vm1380_vm5 = vcmp.lt.f32.partialorder %v1379_v2, 0.0004427343 }
 0x30b   :  { %v1079_v44 = vand.u32 2147483647, %v2786_v49  ;;  %v1372_v20 = vsel %vm1371_vm4, %v1369_v14, %v1366_v10 }
 0x30c   :  { %v2282_v16 = vpop.eup %2281  ;;  %v932_v35 = vpop.f32.mrf.mxu3  ;;  %v1492_v31 = vadd.f32 %v1372_v20, %v1044_v18  ;;  %v1378_v36 = vmul.f32 %v2276_v3, %v1377_v23 }
 0x30d   :  { %v1555_v50 = vmul.f32 %v2282_v16, %v2743_v59  ;;  %v1111_v15 = vsub.f32 0.0, %v1079_v44  ;;  %v933_v28 = vadd.f32 %v932_v35, %v843_v63  ;;  %v1045_v59 = vmax.f32 %v2771_v33, 0.0  ;;  %v850_v3 = vpop.f32.mrf.mxu2 }
 0x30f   :  { %v2284_v24 = vpop.eup %2283  ;;  %v2100_v30 = vpack.c.bf16 %v1555_v50, %v1554_v17  ;;  %v1166_v27 = vmul.f32 1.442695, %v1111_v15  ;;  %v980_v8 = vmul.f32 %v2755_v7, %v933_v28 }
 0x310   :  { %v2286_v38 = vpop.eup %2285  ;;  %v1382_v41 = vadd.f32 1.0, %v2284_v24  ;;  %v1385_v45 = vmul.f32 -0.5, %v2284_v24  ;;  %v1388_v29 = vand.u32 2147483647, %v2284_v24 }
 0x311   :  { %2140 = vst [vmem:[#allocation8 + $0x48] sm:$0xff] %v2100_v30   ;;  %v1375_v55 = vmul.f32 0.6931472, %v2286_v38  ;;  %2287 = vpow2.f32 %v1166_v27  ;;  %v2794_v43 = vadd.f32 %v2761_v40, %v980_v8 }
 0x312   :  { %2289 = vlog2.f32 %v1382_v41  ;;  %v1386_v56 = vadd.f32 1.0, %v1385_v45  ;;  %vm1389_vm6 = vcmp.lt.f32.partialorder %v1388_v29, 0.0004427343 }
 0x313   :  { %2291 = vtanh.f32 %v1492_v31  ;;  %v1381_v25 = vsel %vm1380_vm5, %v1378_v36, %v1375_v55  ;;  %v1080_v51 = vand.u32 2147483647, %v2794_v43 }
 0x314   :  { %v1493_v53 = vadd.f32 %v1381_v25, %v1045_v59  ;;  %v934_v47 = vpop.f32.mrf.mxu3  ;;  %v1387_v37 = vmul.f32 %v2284_v24, %v1386_v56 }
 0x315   :  { %v1112_v63 = vsub.f32 0.0, %v1080_v51  ;;  %v935_v26 = vadd.f32 %v934_v47, %v845_v54  ;;  %v853_v31 = vpop.f32.mrf.mxu2 }
 0x316   :  { %2293 = vtanh.f32 %v1493_v53 }
 0x317   :  { %v2288_v0 = vpop.eup %2287  ;;  %v1168_v61 = vmul.f32 1.442695, %v1112_v63  ;;  %v981_v62 = vmul.f32 %v2755_v7, %v935_v26  ;;  %v1048_v26 = vmax.f32 %v2794_v43, 0.0 }
 0x318   :  { %v2290_v60 = vpop.eup %2289  ;;  %v1391_v42 = vadd.f32 1.0, %v2288_v0  ;;  %v1394_v22 = vmul.f32 -0.5, %v2288_v0  ;;  %v1397_v54 = vand.u32 2147483647, %v2288_v0 }
 0x319   :  { %v2292_v52 = vpop.eup %2291  ;;  %v1384_v1 = vmul.f32 0.6931472, %v2290_v60  ;;  %2295 = vpow2.f32 %v1168_v61  ;;  %v2800_v34 = vadd.f32 %v2761_v40, %v981_v62 }
 0x31a   :  { %2297 = vlog2.f32 %v1391_v42  ;;  %v1556_v57 = vmul.f32 %v2292_v52, %v2764_v11  ;;  %v1395_v5 = vadd.f32 1.0, %v1394_v22  ;;  %vm1398_vm7 = vcmp.lt.f32.partialorder %v1397_v54, 0.0004427343 }
 0x31b   :  { %v1081_v9 = vand.u32 2147483647, %v2800_v34  ;;  %v1390_v32 = vsel %vm1389_vm6, %v1387_v37, %v1384_v1 }
 0x31c   :  { %v2294_v46 = vpop.eup %2293  ;;  %v937_v4 = vpop.f32.mrf.mxu3  ;;  %v1494_v12 = vadd.f32 %v1390_v32, %v1046_v58  ;;  %v1396_v18 = vmul.f32 %v2288_v0, %v1395_v5 }
 0x31d   :  { %v1557_v21 = vmul.f32 %v2294_v46, %v2771_v33  ;;  %v1113_v39 = vsub.f32 0.0, %v1081_v9  ;;  %v938_v19 = vadd.f32 %v937_v4, %v848_v48  ;;  %v1047_v33 = vmax.f32 %v2786_v49, 0.0  ;;  %v855_v58 = vpop.f32.mrf.mxu2 }
 0x31f   :  { %v2296_v13 = vpop.eup %2295  ;;  %v2105_v10 = vpack.c.bf16 %v1557_v21, %v1556_v57  ;;  %v1170_v14 = vmul.f32 1.442695, %v1113_v39  ;;  %v982_v44 = vmul.f32 %v2755_v7, %v938_v19 }
 0x320   :  { %v2298_v16 = vpop.eup %2297  ;;  %v1400_v17 = vadd.f32 1.0, %v2296_v13  ;;  %v1403_v35 = vmul.f32 -0.5, %v2296_v13  ;;  %v1406_v8 = vand.u32 2147483647, %v2296_v13 }
 0x321   :  { %2141 = vst [vmem:[#allocation8 + $0x50] sm:$0xff] %v2105_v10   ;;  %v1393_v11 = vmul.f32 0.6931472, %v2298_v16  ;;  %2299 = vpow2.f32 %v1170_v14  ;;  %v2808_v20 = vadd.f32 %v2761_v40, %v982_v44 }
 0x322   :  { %2301 = vlog2.f32 %v1400_v17  ;;  %v1404_v30 = vadd.f32 1.0, %v1403_v35  ;;  %vm1407_vm8 = vcmp.lt.f32.partialorder %v1406_v8, 0.0004427343 }
 0x323   :  { %2303 = vtanh.f32 %v1494_v12  ;;  %v1399_v50 = vsel %vm1398_vm7, %v1396_v18, %v1393_v11  ;;  %v1082_v23 = vand.u32 2147483647, %v2808_v20 }
 0x324   :  { %v1495_v15 = vadd.f32 %v1399_v50, %v1047_v33  ;;  %v939_v28 = vpop.f32.mrf.mxu3  ;;  %v1405_v51 = vmul.f32 %v2296_v13, %v1404_v30  ;;  %v1050_v30 = vmax.f32 %v2808_v20, 0.0 }
 0x325   :  { %v1114_v2 = vsub.f32 0.0, %v1082_v23  ;;  %v940_v24 = vadd.f32 %v939_v28, %v850_v3 }
 0x326   :  { %2305 = vtanh.f32 %v1495_v15  ;;  %v858_v15 = vpop.f32.mrf.mxu2 }
 0x327   :  { %v2300_v27 = vpop.eup %2299  ;;  %v1172_v38 = vmul.f32 1.442695, %v1114_v2  ;;  %v983_v41 = vmul.f32 %v2755_v7, %v940_v24 }
 0x328   :  { %v2302_v55 = vpop.eup %2301  ;;  %v1409_v36 = vadd.f32 1.0, %v2300_v27  ;;  %v1412_v48 = vmul.f32 -0.5, %v2300_v27  ;;  %v1415_v42 = vand.u32 2147483647, %v2300_v27 }
 0x329   :  { %v2304_v59 = vpop.eup %2303  ;;  %v1402_v45 = vmul.f32 0.6931472, %v2302_v55  ;;  %2307 = vpow2.f32 %v1172_v38  ;;  %v2814_v25 = vadd.f32 %v2761_v40, %v983_v41 }
 0x32a   :  { %2309 = vlog2.f32 %v1409_v36  ;;  %v1558_v63 = vmul.f32 %v2304_v59, %v2780_v6  ;;  %v1413_v61 = vadd.f32 1.0, %v1412_v48  ;;  %vm1416_vm9 = vcmp.lt.f32.partialorder %v1415_v42, 0.0004427343 }
 0x32b   :  { %v1083_v53 = vand.u32 2147483647, %v2814_v25  ;;  %v1408_v56 = vsel %vm1407_vm8, %v1405_v51, %v1402_v45 }
 0x32c   :  { %v2306_v47 = vpop.eup %2305  ;;  %v942_v0 = vpop.f32.mrf.mxu3  ;;  %v1496_v22 = vadd.f32 %v1408_v56, %v1048_v26  ;;  %v1414_v32 = vmul.f32 %v2300_v27, %v1413_v61 }
 0x32d   :  { %v1559_v29 = vmul.f32 %v2306_v47, %v2786_v49  ;;  %v1115_v62 = vsub.f32 0.0, %v1083_v53  ;;  %v943_v60 = vadd.f32 %v942_v0, %v853_v31  ;;  %v1049_v49 = vmax.f32 %v2800_v34, 0.0 }
 0x32f   :  { %v2308_v52 = vpop.eup %2307  ;;  %v2110_v1 = vpack.c.bf16 %v1559_v29, %v1558_v63  ;;  %v1174_v37 = vmul.f32 1.442695, %v1115_v62  ;;  %v984_v9 = vmul.f32 %v2755_v7, %v943_v60  ;;  %v860_v60 = vpop.f32.mrf.mxu2 }
 0x330   :  { %v2310_v46 = vpop.eup %2309  ;;  %v1418_v57 = vadd.f32 1.0, %v2308_v52  ;;  %v1421_v4 = vmul.f32 -0.5, %v2308_v52  ;;  %v1424_v14 = vand.u32 2147483647, %v2308_v52 }
 0x331   :  { %2142 = vst [vmem:[#allocation8 + $0x58] sm:$0xff] %v2110_v1   ;;  %v1411_v6 = vmul.f32 0.6931472, %v2310_v46  ;;  %2311 = vpow2.f32 %v1174_v37  ;;  %v2822_v3 = vadd.f32 %v2761_v40, %v984_v9 }
 0x332   :  { %2313 = vlog2.f32 %v1418_v57  ;;  %v1422_v10 = vadd.f32 1.0, %v1421_v4  ;;  %vm1425_vm10 = vcmp.lt.f32.partialorder %v1424_v14, 0.0004427343 }
 0x333   :  { %2315 = vtanh.f32 %v1496_v22  ;;  %v1417_v21 = vsel %vm1416_vm9, %v1414_v32, %v1411_v6  ;;  %v1084_v5 = vand.u32 2147483647, %v2822_v3  ;;  %v1052_v14 = vmax.f32 %v2822_v3, 0.0 }
 0x334   :  { %v1497_v39 = vadd.f32 %v1417_v21, %v1049_v49  ;;  %v944_v19 = vpop.f32.mrf.mxu3  ;;  %v1423_v23 = vmul.f32 %v2308_v52, %v1422_v10 }
 0x335   :  { %v1116_v54 = vsub.f32 0.0, %v1084_v5  ;;  %v945_v13 = vadd.f32 %v944_v19, %v855_v58 }
 0x336   :  { %2317 = vtanh.f32 %v1497_v39 }
 0x337   :  { %v2312_v12 = vpop.eup %2311  ;;  %v1176_v44 = vmul.f32 1.442695, %v1116_v54  ;;  %v985_v16 = vmul.f32 %v2755_v7, %v945_v13 }
 0x338   :  { %v2314_v17 = vpop.eup %2313  ;;  %v1427_v11 = vadd.f32 1.0, %v2312_v12  ;;  %v1430_v35 = vmul.f32 -0.5, %v2312_v12  ;;  %v1433_v36 = vand.u32 2147483647, %v2312_v12 }
 0x339   :  { %v2316_v18 = vpop.eup %2315  ;;  %v1420_v33 = vmul.f32 0.6931472, %v2314_v17  ;;  %2319 = vpow2.f32 %v1176_v44  ;;  %v2828_v50 = vadd.f32 %v2761_v40, %v985_v16 }
 0x33a   :  { %2321 = vlog2.f32 %v1427_v11  ;;  %v1560_v24 = vmul.f32 %v2316_v18, %v2794_v43  ;;  %v1431_v38 = vadd.f32 1.0, %v1430_v35  ;;  %vm1434_vm11 = vcmp.lt.f32.partialorder %v1433_v36, 0.0004427343 }
 0x33b   :  { %v1085_v28 = vand.u32 2147483647, %v2828_v50  ;;  %v1426_v31 = vsel %vm1425_vm10, %v1423_v23, %v1420_v33 }
 0x33c   :  { %v2318_v2 = vpop.eup %2317  ;;  %v947_v27 = vpop.f32.mrf.mxu3  ;;  %v1498_v48 = vadd.f32 %v1426_v31, %v1050_v30  ;;  %v1432_v26 = vmul.f32 %v2312_v12, %v1431_v38 }
 0x33d   :  { %v1561_v8 = vmul.f32 %v2318_v2, %v2800_v34  ;;  %v1117_v41 = vsub.f32 0.0, %v1085_v28  ;;  %v948_v55 = vadd.f32 %v947_v27, %v858_v15  ;;  %v1051_v34 = vmax.f32 %v2814_v25, 0.0 }
 0x33f   :  { %v2320_v59 = vpop.eup %2319  ;;  %v2115_v45 = vpack.c.bf16 %v1561_v8, %v1560_v24  ;;  %v1178_v51 = vmul.f32 1.442695, %v1117_v41  ;;  %v986_v53 = vmul.f32 %v2755_v7, %v948_v55 }
 0x340   :  { %v2322_v47 = vpop.eup %2321  ;;  %v1436_v63 = vadd.f32 1.0, %v2320_v59  ;;  %v1439_v29 = vmul.f32 -0.5, %v2320_v59  ;;  %v1442_v58 = vand.u32 2147483647, %v2320_v59 }
 0x341   :  { %2143 = vst [vmem:[#allocation8 + $0x60] sm:$0xff] %v2115_v45   ;;  %v1429_v43 = vmul.f32 0.6931472, %v2322_v47  ;;  %2323 = vpow2.f32 %v1178_v51  ;;  %v2836_v56 = vadd.f32 %v2761_v40, %v986_v53 }
 0x342   :  { %2325 = vlog2.f32 %v1436_v63  ;;  %v1440_v37 = vadd.f32 1.0, %v1439_v29  ;;  %vm1443_vm12 = vcmp.lt.f32.partialorder %v1442_v58, 0.0004427343 }
 0x343   :  { %2327 = vtanh.f32 %v1498_v48  ;;  %v1435_v0 = vsel %vm1434_vm11, %v1432_v26, %v1429_v43  ;;  %v1086_v61 = vand.u32 2147483647, %v2836_v56  ;;  %v1054_v53 = vmax.f32 %v2836_v56, 0.0 }
 0x344   :  { %v1499_v62 = vadd.f32 %v1435_v0, %v1051_v34  ;;  %v949_v42 = vpop.f32.mrf.mxu3  ;;  %v1441_v5 = vmul.f32 %v2320_v59, %v1440_v37 }
 0x345   :  { %v1118_v52 = vsub.f32 0.0, %v1086_v61  ;;  %v950_v1 = vadd.f32 %v949_v42, %v860_v60 }
 0x346   :  { %2329 = vtanh.f32 %v1499_v62 }
 0x347   :  { %v2324_v22 = vpop.eup %2323  ;;  %v1180_v9 = vmul.f32 1.442695, %v1118_v52  ;;  %v987_v46 = vmul.f32 %v2755_v7, %v950_v1 }
 0x348   :  { %v2326_v57 = vpop.eup %2325  ;;  %v1445_v6 = vadd.f32 1.0, %v2324_v22  ;;  %v1448_v4 = vmul.f32 -0.5, %v2324_v22  ;;  %v1451_v44 = vand.u32 2147483647, %v2324_v22 }
 0x349   :  { %v2328_v32 = vpop.eup %2327  ;;  %v1438_v49 = vmul.f32 0.6931472, %v2326_v57  ;;  %2331 = vpow2.f32 %v1180_v9  ;;  %v2842_v21 = vadd.f32 %v2761_v40, %v987_v46 }
 0x34a   :  { %2333 = vlog2.f32 %v1445_v6  ;;  %v1562_v54 = vmul.f32 %v2328_v32, %v2808_v20  ;;  %v1449_v10 = vadd.f32 1.0, %v1448_v4  ;;  %v1053_v20 = vmax.f32 %v2828_v50, 0.0 }
 0x34b   :  { %v1087_v39 = vand.u32 2147483647, %v2842_v21  ;;  %v1444_v13 = vsel %vm1443_vm12, %v1441_v5, %v1438_v49  ;;  %vm1452_vm13 = vcmp.lt.f32.partialorder %v1451_v44, 0.0004427343  ;;  %v1055_v29 = vmax.f32 %v2842_v21, 0.0 }
 0x34c   :  { %v2330_v19 = vpop.eup %2329  ;;  %v1500_v18 = vadd.f32 %v1444_v13, %v1052_v14  ;;  %v1450_v23 = vmul.f32 %v2324_v22, %v1449_v10 }
 0x34d   :  { %v1563_v7 = vmul.f32 %v2330_v19, %v2814_v25  ;;  %v1119_v12 = vsub.f32 0.0, %v1087_v39 }
 0x34f   :  { %v2332_v16 = vpop.eup %2331  ;;  %v2120_v17 = vpack.c.bf16 %v1563_v7, %v1562_v54  ;;  %v1182_v40 = vmul.f32 1.442695, %v1119_v12 }
 0x350   :  { %v2334_v11 = vpop.eup %2333  ;;  %v1454_v33 = vadd.f32 1.0, %v2332_v16  ;;  %v1457_v15 = vmul.f32 -0.5, %v2332_v16  ;;  %v1460_v31 = vand.u32 2147483647, %v2332_v16 }
 0x351   :  { %2144 = vst [vmem:[#allocation8 + $0x68] sm:$0xff] %v2120_v17   ;;  %v1447_v35 = vmul.f32 0.6931472, %v2334_v11  ;;  %2335 = vpow2.f32 %v1182_v40 }
 0x352   :  { %2337 = vlog2.f32 %v1454_v33  ;;  %v1458_v24 = vadd.f32 1.0, %v1457_v15  ;;  %vm1461_vm14 = vcmp.lt.f32.partialorder %v1460_v31, 0.0004427343 }
 0x353   :  { %v1453_v25 = vsel %vm1452_vm13, %v1450_v23, %v1447_v35  ;;  %2339 = vtanh.f32 %v1500_v18 }
 0x354   :  { %v1501_v28 = vadd.f32 %v1453_v25, %v1053_v20  ;;  %v1459_v55 = vmul.f32 %v2332_v16, %v1458_v24 }
 0x356   :  { %2341 = vtanh.f32 %v1501_v28 }
 0x357   :  { %v2336_v2 = vpop.eup %2335 }
 0x358   :  { %v2338_v30 = vpop.eup %2337  ;;  %v1463_v27 = vadd.f32 1.0, %v2336_v2  ;;  %v1466_v38 = vmul.f32 -0.5, %v2336_v2  ;;  %v1469_v47 = vand.u32 2147483647, %v2336_v2 }
 0x359   :  { %v1456_v8 = vmul.f32 0.6931472, %v2338_v30  ;;  %v2340_v41 = vpop.eup %2339 }
 0x35a   :  { %2343 = vlog2.f32 %v1463_v27  ;;  %v1564_v59 = vmul.f32 %v2340_v41, %v2822_v3  ;;  %v1467_v51 = vadd.f32 1.0, %v1466_v38  ;;  %vm1470_vm15 = vcmp.lt.f32.partialorder %v1469_v47, 0.0004427343 }
 0x35b   :  { %v1462_v48 = vsel %vm1461_vm14, %v1459_v55, %v1456_v8 }
 0x35c   :  { %v2342_v36 = vpop.eup %2341  ;;  %v1502_v26 = vadd.f32 %v1462_v48, %v1054_v53  ;;  %v1468_v0 = vmul.f32 %v2336_v2, %v1467_v51 }
 0x35d   :  { %v1565_v45 = vmul.f32 %v2342_v36, %v2828_v50 }
 0x35e   :  { %2345 = vtanh.f32 %v1502_v26 }
 0x35f   :  { %v2125_v63 = vpack.c.bf16 %v1565_v45, %v1564_v59 }
 0x360   :  { %v2344_v43 = vpop.eup %2343 }
 0x361   :  { %2145 = vst [vmem:[#allocation8 + $0x70] sm:$0xff] %v2125_v63   ;;  %v1465_v34 = vmul.f32 0.6931472, %v2344_v43 }
 0x363   :  { %v1471_v61 = vsel %vm1470_vm15, %v1468_v0, %v1465_v34 }
 0x364   :  { %v1503_v62 = vadd.f32 %v1471_v61, %v1055_v29  ;;  %v2346_v3 = vpop.eup %2345 }
 0x365   :  { %v1566_v60 = vmul.f32 %v2346_v3, %v2836_v56 }
 0x366   :  { %2347 = vtanh.f32 %v1503_v62 }
 0x36c   :  { %v2348_v50 = vpop.eup %2347 }
 0x36d   :  { %v1567_v42 = vmul.f32 %v2348_v50, %v2842_v21 }
 0x36f   :  { %v2130_v52 = vpack.c.bf16 %v1567_v42, %v1566_v60 }
 0x371   :  { %2146 = vst [vmem:[#allocation8 + $0x78] sm:$0xff] %v2130_v52  }
 0x372   :  { %1644 = dma.vmem_to_hbm [thread:$0]  %s1637_s4, 2048, %s1639_s19, [#allocation4], %s2458_s9, %s2458_s9, %s2459_s10  }
 0x373   :  { %2451 = dma.done.wait [#allocation4], 2048  }
 0x374   :  { %2452 = vsyncadd [#allocation4], 4294965248 }
 0x375   :  { %1649 = vsyncpa [#allocation3], 1 }
 0x376   :  { %1650 = vsyncpa [#allocation6], 1 }
 0x377   :  { %1651 = vsyncpa [#allocation4], 1 }

</bundles_post_ra>
